<compile_context>
chip_gen: v7x
topology: tpu7x:2x2x1
jax: 0.10.0
libtpu: 0.0.40
codegen_flags: <defaults>
</compile_context>

<pallas_src>
import functools
import math

import jax
import jax.numpy as jnp
from jax import lax
from jax.experimental import pallas as pl
from jax.experimental.pallas import tpu as pltpu


LANE = 128   # TPU lane width: logits padded to 128 for a lane-dense store
SUB = 8      # f32 sublane tile: batch padded to a multiple of 8


# ----------------------------- Pallas kernel ---------------------------------


def make_lstm_kernel(num_layers: int, hidden_size: int, seq_len: int):
    L, H, T = num_layers, hidden_size, seq_len
    G = 4 * H

    def kernel(x_ref, wih0_ref, wbig_ref, bias_ref, fcw_ref, fcb_ref,
               logits_ref, xw_ref):
        # x_ref      (T*SUB, C)   one batch tile, time-major (rows t*8 .. t*8+7)
        # wih0_ref   (C, 4H)      layer-0 input weights, pre-transposed
        # wbig_ref   (L*H, L*4H)  block matrix; col-block l holds [Wih_l^T ; Whh_l^T]
        # bias_ref   (1, L*4H)    fused b_ih + b_hh for every layer
        # fcw_ref    (H, LANE)    fc weight, lane-padded
        # fcb_ref    (1, LANE)
        # logits_ref (SUB, LANE)
        # xw_ref     (T*SUB, 4H)  scratch: hoisted layer-0 input projection

        # ---- hoisted layer-0 input projection: one matmul for the whole sequence
        xw_ref[...] = jnp.dot(x_ref[...], wih0_ref[...],
                              preferred_element_type=jnp.float32)

        wbig = wbig_ref[...]    # constant across the unrolled loop, held in vregs
        bias = bias_ref[...]

        h = [jnp.zeros((SUB, H), jnp.float32) for _ in range(L)]
        c = [jnp.zeros((SUB, H), jnp.float32) for _ in range(L)]

        # ---- cross-layer wavefront: global step s runs timestep (s - l) of layer l.
        # All layers' gate pre-activations come from ONE fused matmul on the hidden
        # states as they were at the END of the previous step (snapshot `h`), and
        # updates are written to new_h/new_c, so there is no intra-step hazard.
        for s in range(T + L - 1):
            hin = h[0] if L == 1 else jnp.concatenate(h, axis=1)      # (SUB, L*H)
            big = jnp.dot(hin, wbig, preferred_element_type=jnp.float32) + bias
            new_h, new_c = list(h), list(c)
            for l in range(L):
                t = s - l
                if not (0 <= t < T):           # layer inactive at this wavefront step
                    continue
                gates = big[:, l * G:(l + 1) * G]                      # (SUB, 4H)
                if l == 0:
                    # static, sublane-aligned (8, 128) slice of the hoisted projection
                    gates = gates + xw_ref[t * SUB:(t + 1) * SUB, :]
                sig = jax.nn.sigmoid(gates)                # 1 full-width EUP push
                g_g = jnp.tanh(gates[:, 2 * H:3 * H])      # 1 EUP push (g gate only)
                c_n = sig[:, H:2 * H] * c[l] + sig[:, 0:H] * g_g
                h_n = sig[:, 3 * H:4 * H] * jnp.tanh(c_n)
                new_h[l], new_c[l] = h_n, c_n
            h, c = new_h, new_c

        # features = out[:, -1, :] == final hidden state of the last layer.
        # Lane-dense (SUB, 128) store; wrapper slices down to (B, num_classes).
        logits_ref[...] = (
            jnp.dot(h[L - 1], fcw_ref[...], preferred_element_type=jnp.float32)
            + fcb_ref[...]
        )

    return kernel


# ----------------------------- Param preparation ------------------------------


def prepare_params(layer_params, fc_w, fc_b, hidden_size, num_classes):
    """One-time weight prep (done OUTSIDE the per-call jitted graph).

    layer_params: list of (w_ih (4H,in), w_hh (4H,H), b_ih (4H,), b_hh (4H,))
                  in PyTorch nn.LSTM layout.
    Returns wih0_t (C,4H), w_big (L*H, L*4H), bias_all (1, L*4H),
            fcw_pad (H,128), fcb_pad (1,128).
    """
    H = hidden_size
    L = len(layer_params)
    G = 4 * H

    wih0_t = jnp.asarray(layer_params[0][0].T, jnp.float32)       # (C, 4H)

    w_big = jnp.zeros((L * H, L * G), jnp.float32)
    biases = []
    for l, (w_ih, w_hh, b_ih, b_hh) in enumerate(layer_params):
        col = slice(l * G, (l + 1) * G)
        w_big = w_big.at[l * H:(l + 1) * H, col].set(w_hh.T)      # recurrent block
        if l > 0:
            w_big = w_big.at[(l - 1) * H:l * H, col].set(w_ih.T)  # input from layer l-1
        biases.append(b_ih + b_hh)
    bias_all = jnp.concatenate(biases).reshape(1, L * G).astype(jnp.float32)

    fcw_pad = jnp.zeros((H, LANE), jnp.float32).at[:, :num_classes].set(fc_w.T)
    fcb_pad = jnp.zeros((1, LANE), jnp.float32).at[:, :num_classes].set(fc_b)
    return wih0_t, w_big, bias_all, fcw_pad, fcb_pad


# ----------------------------- Python wrapper ---------------------------------


@functools.partial(jax.jit,
                   static_argnames=("num_layers", "hidden_size", "num_classes"))
def lstm_classifier_forward(x, wih0_t, w_big, bias_all, fcw_pad, fcb_pad,
                            *, num_layers, hidden_size, num_classes):
    """x: (B, C, T) float32 — same layout as the PyTorch module's input."""
    B, C, T = x.shape
    H = hidden_size
    L = num_layers
    assert num_classes <= LANE

    nb = pl.cdiv(B, SUB)      # number of 8-row batch tiles (each a grid step)
    BP = nb * SUB

    # Pad batch to the sublane tile, go time-major, group into batch tiles:
    # (B, C, T) -> (nb, T*SUB, C)
    x_pad = jnp.zeros((BP, C, T), jnp.float32).at[:B].set(x.astype(jnp.float32))
    x_tm = (jnp.transpose(x_pad, (2, 0, 1))        # (T, BP, C)
              .reshape(T, nb, SUB, C)
              .transpose(1, 0, 2, 3)               # (nb, T, SUB, C)
              .reshape(nb, T * SUB, C))

    kernel = make_lstm_kernel(L, H, T)

    def full_spec(arr):
        nd = arr.ndim
        return pl.BlockSpec(arr.shape, lambda i, _nd=nd: (0,) * _nd)

    logits_pad = pl.pallas_call(
        kernel,
        out_shape=jax.ShapeDtypeStruct((nb, SUB, LANE), jnp.float32),
        grid_spec=pltpu.PrefetchScalarGridSpec(
            num_scalar_prefetch=0,
            grid=(nb,),
            in_specs=[
                pl.BlockSpec((None, T * SUB, C), lambda i: (i, 0, 0)),   # x batch tile
                full_spec(wih0_t),
                full_spec(w_big),
                full_spec(bias_all),
                full_spec(fcw_pad),
                full_spec(fcb_pad),
            ],
            out_specs=pl.BlockSpec((None, SUB, LANE), lambda i: (i, 0, 0)),
            scratch_shapes=[pltpu.VMEM((T * SUB, 4 * H), jnp.float32)],
        ),
        compiler_params=pltpu.CompilerParams(
            # batch tiles are independent -> shard across v7x's two TensorCores
            dimension_semantics=("parallel",),
        ),
    )(x_tm, wih0_t, w_big, bias_all, fcw_pad, fcb_pad)

    return logits_pad.reshape(BP, LANE)[:B, :num_classes]


# ----------------------------- Param init (PyTorch-style) ---------------------


def init_params(key, input_size, hidden_size, num_layers, num_classes):
    H = hidden_size
    stdv = 1.0 / math.sqrt(H)
    layer_params = []
    for layer in range(num_layers):
        in_feat = input_size if layer == 0 else H
        key, k1, k2, k3, k4 = jax.random.split(key, 5)
        w_ih = jax.random.uniform(k1, (4 * H, in_feat), jnp.float32, -stdv, stdv)
        w_hh = jax.random.uniform(k2, (4 * H, H), jnp.float32, -stdv, stdv)
        b_ih = jax.random.uniform(k3, (4 * H,), jnp.float32, -stdv, stdv)
        b_hh = jax.random.uniform(k4, (4 * H,), jnp.float32, -stdv, stdv)
        layer_params.append((w_ih, w_hh, b_ih, b_hh))
    key, k5, k6 = jax.random.split(key, 3)
    bound = 1.0 / math.sqrt(H)
    fc_w = jax.random.uniform(k5, (num_classes, H), jnp.float32, -bound, bound)
    fc_b = jax.random.uniform(k6, (num_classes,), jnp.float32, -bound, bound)
    return layer_params, fc_w, fc_b


# ----------------------------- Pure-JAX reference -----------------------------


def reference_forward(x, layer_params, fc_w, fc_b, hidden_size):
    B, C, T = x.shape
    H = hidden_size
    seq = jnp.transpose(x, (0, 2, 1))  # (B, T, C), batch_first
    for (w_ih, w_hh, b_ih, b_hh) in layer_params:
        def step(carry, x_t, w_ih=w_ih, w_hh=w_hh, b_ih=b_ih, b_hh=b_hh):
            h, c = carry
            gates = x_t @ w_ih.T + h @ w_hh.T + b_ih + b_hh
            i_g = jax.nn.sigmoid(gates[:, 0 * H:1 * H])
            f_g = jax.nn.sigmoid(gates[:, 1 * H:2 * H])
            g_g = jnp.tanh(gates[:, 2 * H:3 * H])
            o_g = jax.nn.sigmoid(gates[:, 3 * H:4 * H])
            c = f_g * c + i_g * g_g
            h = o_g * jnp.tanh(c)
            return (h, c), h
        h0 = jnp.zeros((B, H), jnp.float32)
        c0 = jnp.zeros((B, H), jnp.float32)
        (_, _), outs = lax.scan(step, (h0, c0), jnp.transpose(seq, (1, 0, 2)))
        seq = jnp.transpose(outs, (1, 0, 2))
    features = seq[:, -1, :]
    return features @ fc_w.T + fc_b


# ----------------------------- Main -------------------------------------------


if __name__ == "__main__":
    B, C, T = 2, 4, 16            # batch, channels(=input_size), sequence_length
    hidden_size = 32
    num_layers = 2
    num_classes = 5

    key = jax.random.PRNGKey(0)
    key, xk = jax.random.split(key)
    x = jax.random.normal(xk, (B, C, T), jnp.float32)

    layer_params, fc_w, fc_b = init_params(key, C, hidden_size, num_layers, num_classes)
    prepared = prepare_params(layer_params, fc_w, fc_b, hidden_size, num_classes)

    logits = lstm_classifier_forward(
        x, *prepared,
        num_layers=num_layers, hidden_size=hidden_size, num_classes=num_classes,
    )
    logits = jax.block_until_ready(logits)

    ref = reference_forward(x, layer_params, fc_w, fc_b, hidden_size)
    assert logits.shape == (B, num_classes)
    assert jnp.allclose(logits, ref, atol=1e-4, rtol=1e-4), "mismatch vs pure-JAX reference"

    print("KERNEL_OK")
</pallas_src>

<mosaic_0001>
module attributes {stable_mosaic.version = 11 : i64} {
  func.func @kernel(%arg0: i32, %arg1: memref<1x128x4xf32, #tpu.memory_space<vmem>>, %arg2: memref<4x128xf32, #tpu.memory_space<vmem>>, %arg3: memref<64x256xf32, #tpu.memory_space<vmem>>, %arg4: memref<1x256xf32, #tpu.memory_space<vmem>>, %arg5: memref<32x128xf32, #tpu.memory_space<vmem>>, %arg6: memref<1x128xf32, #tpu.memory_space<vmem>>, %arg7: memref<1x8x128xf32, #tpu.memory_space<vmem>>, %arg8: memref<128x128xf32, #tpu.memory_space<vmem>>) attributes {dimension_semantics = [#tpu.dimension_semantics<parallel>], iteration_bounds = array<i64: 1>, scalar_prefetch = 0 : i64, scratch_operands = 1 : i64, tpu.core_type = #tpu.core_type<tc>, window_params = [{transform_indices = @transform_0, window_bounds = array<i64: 1, 128, 4>}, {pipeline_mode = #tpu.pipeline_mode<synchronous>, transform_indices = @transform_1, window_bounds = array<i64: 4, 128>}, {pipeline_mode = #tpu.pipeline_mode<synchronous>, transform_indices = @transform_2, window_bounds = array<i64: 64, 256>}, {pipeline_mode = #tpu.pipeline_mode<synchronous>, transform_indices = @transform_3, window_bounds = array<i64: 1, 256>}, {pipeline_mode = #tpu.pipeline_mode<synchronous>, transform_indices = @transform_4, window_bounds = array<i64: 32, 128>}, {pipeline_mode = #tpu.pipeline_mode<synchronous>, transform_indices = @transform_5, window_bounds = array<i64: 1, 128>}, {transform_indices = @transform_6, window_bounds = array<i64: 1, 8, 128>}]} {
    %c0 = arith.constant 0 : index
    %c0_0 = arith.constant 0 : index
    %c0_1 = arith.constant 0 : index
    %0 = vector.load %arg1[%c0, %c0_0, %c0_1] : memref<1x128x4xf32, #tpu.memory_space<vmem>>, vector<1x128x4xf32>
    %1 = vector.shape_cast %0 : vector<1x128x4xf32> to vector<128x4xf32>
    %c0_2 = arith.constant 0 : index
    %c0_3 = arith.constant 0 : index
    %2 = vector.load %arg2[%c0_2, %c0_3] : memref<4x128xf32, #tpu.memory_space<vmem>>, vector<4x128xf32>
    %cst = arith.constant dense<0.000000e+00> : vector<128x128xf32>
    %3 = tpu.matmul %1, %2, %cst {dimension_numbers = #tpu.dot_dimension_numbers<[1], [0], [0], [1], [0, 0, 1, 1], [], []>} : vector<128x4xf32>, vector<4x128xf32>, vector<128x128xf32> -> vector<128x128xf32>
    %c0_4 = arith.constant 0 : index
    %c0_5 = arith.constant 0 : index
    %4 = vector.load %arg8[%c0_4, %c0_5] : memref<128x128xf32, #tpu.memory_space<vmem>>, vector<128x128xf32>
    tpu.vector_store %arg8[%c0_4, %c0_5], %3 {strides = array<i32>} : memref<128x128xf32, #tpu.memory_space<vmem>>, vector<128x128xf32>,
    %c0_6 = arith.constant 0 : index
    %c0_7 = arith.constant 0 : index
    %5 = vector.load %arg3[%c0_6, %c0_7] : memref<64x256xf32, #tpu.memory_space<vmem>>, vector<64x256xf32>
    %c0_8 = arith.constant 0 : index
    %c0_9 = arith.constant 0 : index
    %6 = vector.load %arg4[%c0_8, %c0_9] : memref<1x256xf32, #tpu.memory_space<vmem>>, vector<1x256xf32>
    %cst_10 = arith.constant 0.000000e+00 : f32
    %7 = vector.broadcast %cst_10 : f32 to vector<8x32xf32>
    %cst_11 = arith.constant 0.000000e+00 : f32
    %8 = vector.broadcast %cst_11 : f32 to vector<8x32xf32>
    %cst_12 = arith.constant 0.000000e+00 : f32
    %9 = vector.broadcast %cst_12 : f32 to vector<8x32xf32>
    %cst_13 = arith.constant 0.000000e+00 : f32
    %10 = vector.broadcast %cst_13 : f32 to vector<8x32xf32>
    %11 = tpu.concatenate %7, %8 in 1 : vector<8x32xf32>, vector<8x32xf32> -> vector<8x64xf32>
    %cst_14 = arith.constant dense<0.000000e+00> : vector<8x256xf32>
    %12 = tpu.matmul %11, %5, %cst_14 {dimension_numbers = #tpu.dot_dimension_numbers<[1], [0], [0], [1], [0, 0, 1, 1], [], []>} : vector<8x64xf32>, vector<64x256xf32>, vector<8x256xf32> -> vector<8x256xf32>
    %13 = vector.broadcast %6 : vector<1x256xf32> to vector<8x256xf32>
    %14 = arith.addf %12, %13 : vector<8x256xf32>
    %15 = vector.extract_strided_slice %14 {offsets = [0, 0], sizes = [8, 128], strides = [1, 1]} : vector<8x256xf32> to vector<8x128xf32>
    %c0_15 = arith.constant 0 : index
    %c0_16 = arith.constant 0 : index
    %16 = vector.load %arg8[%c0_15, %c0_16] : memref<128x128xf32, #tpu.memory_space<vmem>>, vector<8x128xf32>
    %17 = arith.addf %15, %16 : vector<8x128xf32>
    %18 = arith.negf %17 : vector<8x128xf32>
    %19 = math.exp %18 : vector<8x128xf32>
    %cst_17 = arith.constant 1.000000e+00 : f32
    %20 = vector.broadcast %cst_17 : f32 to vector<8x128xf32>
    %21 = arith.addf %20, %19 : vector<8x128xf32>
    %22 = arith.divf %20, %21 : vector<8x128xf32>
    %23 = vector.extract_strided_slice %17 {offsets = [0, 64], sizes = [8, 32], strides = [1, 1]} : vector<8x128xf32> to vector<8x32xf32>
    %24 = math.tanh %23 : vector<8x32xf32>
    %25 = vector.extract_strided_slice %22 {offsets = [0, 32], sizes = [8, 32], strides = [1, 1]} : vector<8x128xf32> to vector<8x32xf32>
    %26 = arith.mulf %25, %9 : vector<8x32xf32>
    %27 = vector.extract_strided_slice %22 {offsets = [0, 0], sizes = [8, 32], strides = [1, 1]} : vector<8x128xf32> to vector<8x32xf32>
    %28 = arith.mulf %27, %24 : vector<8x32xf32>
    %29 = arith.addf %26, %28 : vector<8x32xf32>
    %30 = vector.extract_strided_slice %22 {offsets = [0, 96], sizes = [8, 32], strides = [1, 1]} : vector<8x128xf32> to vector<8x32xf32>
    %31 = math.tanh %29 : vector<8x32xf32>
    %32 = arith.mulf %30, %31 : vector<8x32xf32>
    %33 = tpu.concatenate %32, %8 in 1 : vector<8x32xf32>, vector<8x32xf32> -> vector<8x64xf32>
    %cst_18 = arith.constant dense<0.000000e+00> : vector<8x256xf32>
    %34 = tpu.matmul %33, %5, %cst_18 {dimension_numbers = #tpu.dot_dimension_numbers<[1], [0], [0], [1], [0, 0, 1, 1], [], []>} : vector<8x64xf32>, vector<64x256xf32>, vector<8x256xf32> -> vector<8x256xf32>
    %35 = vector.broadcast %6 : vector<1x256xf32> to vector<8x256xf32>
    %36 = arith.addf %34, %35 : vector<8x256xf32>
    %37 = vector.extract_strided_slice %36 {offsets = [0, 0], sizes = [8, 128], strides = [1, 1]} : vector<8x256xf32> to vector<8x128xf32>
    %c8 = arith.constant 8 : index
    %c0_19 = arith.constant 0 : index
    %38 = vector.load %arg8[%c8, %c0_19] : memref<128x128xf32, #tpu.memory_space<vmem>>, vector<8x128xf32>
    %39 = arith.addf %37, %38 : vector<8x128xf32>
    %40 = arith.negf %39 : vector<8x128xf32>
    %41 = math.exp %40 : vector<8x128xf32>
    %cst_20 = arith.constant 1.000000e+00 : f32
    %42 = vector.broadcast %cst_20 : f32 to vector<8x128xf32>
    %43 = arith.addf %42, %41 : vector<8x128xf32>
    %44 = arith.divf %42, %43 : vector<8x128xf32>
    %45 = vector.extract_strided_slice %39 {offsets = [0, 64], sizes = [8, 32], strides = [1, 1]} : vector<8x128xf32> to vector<8x32xf32>
    %46 = math.tanh %45 : vector<8x32xf32>
    %47 = vector.extract_strided_slice %44 {offsets = [0, 32], sizes = [8, 32], strides = [1, 1]} : vector<8x128xf32> to vector<8x32xf32>
    %48 = arith.mulf %47, %29 : vector<8x32xf32>
    %49 = vector.extract_strided_slice %44 {offsets = [0, 0], sizes = [8, 32], strides = [1, 1]} : vector<8x128xf32> to vector<8x32xf32>
    %50 = arith.mulf %49, %46 : vector<8x32xf32>
    %51 = arith.addf %48, %50 : vector<8x32xf32>
    %52 = vector.extract_strided_slice %44 {offsets = [0, 96], sizes = [8, 32], strides = [1, 1]} : vector<8x128xf32> to vector<8x32xf32>
    %53 = math.tanh %51 : vector<8x32xf32>
    %54 = arith.mulf %52, %53 : vector<8x32xf32>
    %55 = vector.extract_strided_slice %36 {offsets = [0, 128], sizes = [8, 128], strides = [1, 1]} : vector<8x256xf32> to vector<8x128xf32>
    %56 = arith.negf %55 : vector<8x128xf32>
    %57 = math.exp %56 : vector<8x128xf32>
    %cst_21 = arith.constant 1.000000e+00 : f32
    %58 = vector.broadcast %cst_21 : f32 to vector<8x128xf32>
    %59 = arith.addf %58, %57 : vector<8x128xf32>
    %60 = arith.divf %58, %59 : vector<8x128xf32>
    %61 = vector.extract_strided_slice %55 {offsets = [0, 64], sizes = [8, 32], strides = [1, 1]} : vector<8x128xf32> to vector<8x32xf32>
    %62 = math.tanh %61 : vector<8x32xf32>
    %63 = vector.extract_strided_slice %60 {offsets = [0, 32], sizes = [8, 32], strides = [1, 1]} : vector<8x128xf32> to vector<8x32xf32>
    %64 = arith.mulf %63, %10 : vector<8x32xf32>
    %65 = vector.extract_strided_slice %60 {offsets = [0, 0], sizes = [8, 32], strides = [1, 1]} : vector<8x128xf32> to vector<8x32xf32>
    %66 = arith.mulf %65, %62 : vector<8x32xf32>
    %67 = arith.addf %64, %66 : vector<8x32xf32>
    %68 = vector.extract_strided_slice %60 {offsets = [0, 96], sizes = [8, 32], strides = [1, 1]} : vector<8x128xf32> to vector<8x32xf32>
    %69 = math.tanh %67 : vector<8x32xf32>
    %70 = arith.mulf %68, %69 : vector<8x32xf32>
    %71 = tpu.concatenate %54, %70 in 1 : vector<8x32xf32>, vector<8x32xf32> -> vector<8x64xf32>
    %cst_22 = arith.constant dense<0.000000e+00> : vector<8x256xf32>
    %72 = tpu.matmul %71, %5, %cst_22 {dimension_numbers = #tpu.dot_dimension_numbers<[1], [0], [0], [1], [0, 0, 1, 1], [], []>} : vector<8x64xf32>, vector<64x256xf32>, vector<8x256xf32> -> vector<8x256xf32>
    %73 = vector.broadcast %6 : vector<1x256xf32> to vector<8x256xf32>
    %74 = arith.addf %72, %73 : vector<8x256xf32>
    %75 = vector.extract_strided_slice %74 {offsets = [0, 0], sizes = [8, 128], strides = [1, 1]} : vector<8x256xf32> to vector<8x128xf32>
    %c16 = arith.constant 16 : index
    %c0_23 = arith.constant 0 : index
    %76 = vector.load %arg8[%c16, %c0_23] : memref<128x128xf32, #tpu.memory_space<vmem>>, vector<8x128xf32>
    %77 = arith.addf %75, %76 : vector<8x128xf32>
    %78 = arith.negf %77 : vector<8x128xf32>
    %79 = math.exp %78 : vector<8x128xf32>
    %cst_24 = arith.constant 1.000000e+00 : f32
    %80 = vector.broadcast %cst_24 : f32 to vector<8x128xf32>
    %81 = arith.addf %80, %79 : vector<8x128xf32>
    %82 = arith.divf %80, %81 : vector<8x128xf32>
    %83 = vector.extract_strided_slice %77 {offsets = [0, 64], sizes = [8, 32], strides = [1, 1]} : vector<8x128xf32> to vector<8x32xf32>
    %84 = math.tanh %83 : vector<8x32xf32>
    %85 = vector.extract_strided_slice %82 {offsets = [0, 32], sizes = [8, 32], strides = [1, 1]} : vector<8x128xf32> to vector<8x32xf32>
    %86 = arith.mulf %85, %51 : vector<8x32xf32>
    %87 = vector.extract_strided_slice %82 {offsets = [0, 0], sizes = [8, 32], strides = [1, 1]} : vector<8x128xf32> to vector<8x32xf32>
    %88 = arith.mulf %87, %84 : vector<8x32xf32>
    %89 = arith.addf %86, %88 : vector<8x32xf32>
    %90 = vector.extract_strided_slice %82 {offsets = [0, 96], sizes = [8, 32], strides = [1, 1]} : vector<8x128xf32> to vector<8x32xf32>
    %91 = math.tanh %89 : vector<8x32xf32>
    %92 = arith.mulf %90, %91 : vector<8x32xf32>
    %93 = vector.extract_strided_slice %74 {offsets = [0, 128], sizes = [8, 128], strides = [1, 1]} : vector<8x256xf32> to vector<8x128xf32>
    %94 = arith.negf %93 : vector<8x128xf32>
    %95 = math.exp %94 : vector<8x128xf32>
    %cst_25 = arith.constant 1.000000e+00 : f32
    %96 = vector.broadcast %cst_25 : f32 to vector<8x128xf32>
    %97 = arith.addf %96, %95 : vector<8x128xf32>
    %98 = arith.divf %96, %97 : vector<8x128xf32>
    %99 = vector.extract_strided_slice %93 {offsets = [0, 64], sizes = [8, 32], strides = [1, 1]} : vector<8x128xf32> to vector<8x32xf32>
    %100 = math.tanh %99 : vector<8x32xf32>
    %101 = vector.extract_strided_slice %98 {offsets = [0, 32], sizes = [8, 32], strides = [1, 1]} : vector<8x128xf32> to vector<8x32xf32>
    %102 = arith.mulf %101, %67 : vector<8x32xf32>
    %103 = vector.extract_strided_slice %98 {offsets = [0, 0], sizes = [8, 32], strides = [1, 1]} : vector<8x128xf32> to vector<8x32xf32>
    %104 = arith.mulf %103, %100 : vector<8x32xf32>
    %105 = arith.addf %102, %104 : vector<8x32xf32>
    %106 = vector.extract_strided_slice %98 {offsets = [0, 96], sizes = [8, 32], strides = [1, 1]} : vector<8x128xf32> to vector<8x32xf32>
    %107 = math.tanh %105 : vector<8x32xf32>
    %108 = arith.mulf %106, %107 : vector<8x32xf32>
    %109 = tpu.concatenate %92, %108 in 1 : vector<8x32xf32>, vector<8x32xf32> -> vector<8x64xf32>
    %cst_26 = arith.constant dense<0.000000e+00> : vector<8x256xf32>
    %110 = tpu.matmul %109, %5, %cst_26 {dimension_numbers = #tpu.dot_dimension_numbers<[1], [0], [0], [1], [0, 0, 1, 1], [], []>} : vector<8x64xf32>, vector<64x256xf32>, vector<8x256xf32> -> vector<8x256xf32>
    %111 = vector.broadcast %6 : vector<1x256xf32> to vector<8x256xf32>
    %112 = arith.addf %110, %111 : vector<8x256xf32>
    %113 = vector.extract_strided_slice %112 {offsets = [0, 0], sizes = [8, 128], strides = [1, 1]} : vector<8x256xf32> to vector<8x128xf32>
    %c24 = arith.constant 24 : index
    %c0_27 = arith.constant 0 : index
    %114 = vector.load %arg8[%c24, %c0_27] : memref<128x128xf32, #tpu.memory_space<vmem>>, vector<8x128xf32>
    %115 = arith.addf %113, %114 : vector<8x128xf32>
    %116 = arith.negf %115 : vector<8x128xf32>
    %117 = math.exp %116 : vector<8x128xf32>
    %cst_28 = arith.constant 1.000000e+00 : f32
    %118 = vector.broadcast %cst_28 : f32 to vector<8x128xf32>
    %119 = arith.addf %118, %117 : vector<8x128xf32>
    %120 = arith.divf %118, %119 : vector<8x128xf32>
    %121 = vector.extract_strided_slice %115 {offsets = [0, 64], sizes = [8, 32], strides = [1, 1]} : vector<8x128xf32> to vector<8x32xf32>
    %122 = math.tanh %121 : vector<8x32xf32>
    %123 = vector.extract_strided_slice %120 {offsets = [0, 32], sizes = [8, 32], strides = [1, 1]} : vector<8x128xf32> to vector<8x32xf32>
    %124 = arith.mulf %123, %89 : vector<8x32xf32>
    %125 = vector.extract_strided_slice %120 {offsets = [0, 0], sizes = [8, 32], strides = [1, 1]} : vector<8x128xf32> to vector<8x32xf32>
    %126 = arith.mulf %125, %122 : vector<8x32xf32>
    %127 = arith.addf %124, %126 : vector<8x32xf32>
    %128 = vector.extract_strided_slice %120 {offsets = [0, 96], sizes = [8, 32], strides = [1, 1]} : vector<8x128xf32> to vector<8x32xf32>
    %129 = math.tanh %127 : vector<8x32xf32>
    %130 = arith.mulf %128, %129 : vector<8x32xf32>
    %131 = vector.extract_strided_slice %112 {offsets = [0, 128], sizes = [8, 128], strides = [1, 1]} : vector<8x256xf32> to vector<8x128xf32>
    %132 = arith.negf %131 : vector<8x128xf32>
    %133 = math.exp %132 : vector<8x128xf32>
    %cst_29 = arith.constant 1.000000e+00 : f32
    %134 = vector.broadcast %cst_29 : f32 to vector<8x128xf32>
    %135 = arith.addf %134, %133 : vector<8x128xf32>
    %136 = arith.divf %134, %135 : vector<8x128xf32>
    %137 = vector.extract_strided_slice %131 {offsets = [0, 64], sizes = [8, 32], strides = [1, 1]} : vector<8x128xf32> to vector<8x32xf32>
    %138 = math.tanh %137 : vector<8x32xf32>
    %139 = vector.extract_strided_slice %136 {offsets = [0, 32], sizes = [8, 32], strides = [1, 1]} : vector<8x128xf32> to vector<8x32xf32>
    %140 = arith.mulf %139, %105 : vector<8x32xf32>
    %141 = vector.extract_strided_slice %136 {offsets = [0, 0], sizes = [8, 32], strides = [1, 1]} : vector<8x128xf32> to vector<8x32xf32>
    %142 = arith.mulf %141, %138 : vector<8x32xf32>
    %143 = arith.addf %140, %142 : vector<8x32xf32>
    %144 = vector.extract_strided_slice %136 {offsets = [0, 96], sizes = [8, 32], strides = [1, 1]} : vector<8x128xf32> to vector<8x32xf32>
    %145 = math.tanh %143 : vector<8x32xf32>
    %146 = arith.mulf %144, %145 : vector<8x32xf32>
    %147 = tpu.concatenate %130, %146 in 1 : vector<8x32xf32>, vector<8x32xf32> -> vector<8x64xf32>
    %cst_30 = arith.constant dense<0.000000e+00> : vector<8x256xf32>
    %148 = tpu.matmul %147, %5, %cst_30 {dimension_numbers = #tpu.dot_dimension_numbers<[1], [0], [0], [1], [0, 0, 1, 1], [], []>} : vector<8x64xf32>, vector<64x256xf32>, vector<8x256xf32> -> vector<8x256xf32>
    %149 = vector.broadcast %6 : vector<1x256xf32> to vector<8x256xf32>
    %150 = arith.addf %148, %149 : vector<8x256xf32>
    %151 = vector.extract_strided_slice %150 {offsets = [0, 0], sizes = [8, 128], strides = [1, 1]} : vector<8x256xf32> to vector<8x128xf32>
    %c32 = arith.constant 32 : index
    %c0_31 = arith.constant 0 : index
    %152 = vector.load %arg8[%c32, %c0_31] : memref<128x128xf32, #tpu.memory_space<vmem>>, vector<8x128xf32>
    %153 = arith.addf %151, %152 : vector<8x128xf32>
    %154 = arith.negf %153 : vector<8x128xf32>
    %155 = math.exp %154 : vector<8x128xf32>
    %cst_32 = arith.constant 1.000000e+00 : f32
    %156 = vector.broadcast %cst_32 : f32 to vector<8x128xf32>
    %157 = arith.addf %156, %155 : vector<8x128xf32>
    %158 = arith.divf %156, %157 : vector<8x128xf32>
    %159 = vector.extract_strided_slice %153 {offsets = [0, 64], sizes = [8, 32], strides = [1, 1]} : vector<8x128xf32> to vector<8x32xf32>
    %160 = math.tanh %159 : vector<8x32xf32>
    %161 = vector.extract_strided_slice %158 {offsets = [0, 32], sizes = [8, 32], strides = [1, 1]} : vector<8x128xf32> to vector<8x32xf32>
    %162 = arith.mulf %161, %127 : vector<8x32xf32>
    %163 = vector.extract_strided_slice %158 {offsets = [0, 0], sizes = [8, 32], strides = [1, 1]} : vector<8x128xf32> to vector<8x32xf32>
    %164 = arith.mulf %163, %160 : vector<8x32xf32>
    %165 = arith.addf %162, %164 : vector<8x32xf32>
    %166 = vector.extract_strided_slice %158 {offsets = [0, 96], sizes = [8, 32], strides = [1, 1]} : vector<8x128xf32> to vector<8x32xf32>
    %167 = math.tanh %165 : vector<8x32xf32>
    %168 = arith.mulf %166, %167 : vector<8x32xf32>
    %169 = vector.extract_strided_slice %150 {offsets = [0, 128], sizes = [8, 128], strides = [1, 1]} : vector<8x256xf32> to vector<8x128xf32>
    %170 = arith.negf %169 : vector<8x128xf32>
    %171 = math.exp %170 : vector<8x128xf32>
    %cst_33 = arith.constant 1.000000e+00 : f32
    %172 = vector.broadcast %cst_33 : f32 to vector<8x128xf32>
    %173 = arith.addf %172, %171 : vector<8x128xf32>
    %174 = arith.divf %172, %173 : vector<8x128xf32>
    %175 = vector.extract_strided_slice %169 {offsets = [0, 64], sizes = [8, 32], strides = [1, 1]} : vector<8x128xf32> to vector<8x32xf32>
    %176 = math.tanh %175 : vector<8x32xf32>
    %177 = vector.extract_strided_slice %174 {offsets = [0, 32], sizes = [8, 32], strides = [1, 1]} : vector<8x128xf32> to vector<8x32xf32>
    %178 = arith.mulf %177, %143 : vector<8x32xf32>
    %179 = vector.extract_strided_slice %174 {offsets = [0, 0], sizes = [8, 32], strides = [1, 1]} : vector<8x128xf32> to vector<8x32xf32>
    %180 = arith.mulf %179, %176 : vector<8x32xf32>
    %181 = arith.addf %178, %180 : vector<8x32xf32>
    %182 = vector.extract_strided_slice %174 {offsets = [0, 96], sizes = [8, 32], strides = [1, 1]} : vector<8x128xf32> to vector<8x32xf32>
    %183 = math.tanh %181 : vector<8x32xf32>
    %184 = arith.mulf %182, %183 : vector<8x32xf32>
    %185 = tpu.concatenate %168, %184 in 1 : vector<8x32xf32>, vector<8x32xf32> -> vector<8x64xf32>
    %cst_34 = arith.constant dense<0.000000e+00> : vector<8x256xf32>
    %186 = tpu.matmul %185, %5, %cst_34 {dimension_numbers = #tpu.dot_dimension_numbers<[1], [0], [0], [1], [0, 0, 1, 1], [], []>} : vector<8x64xf32>, vector<64x256xf32>, vector<8x256xf32> -> vector<8x256xf32>
    %187 = vector.broadcast %6 : vector<1x256xf32> to vector<8x256xf32>
    %188 = arith.addf %186, %187 : vector<8x256xf32>
    %189 = vector.extract_strided_slice %188 {offsets = [0, 0], sizes = [8, 128], strides = [1, 1]} : vector<8x256xf32> to vector<8x128xf32>
    %c40 = arith.constant 40 : index
    %c0_35 = arith.constant 0 : index
    %190 = vector.load %arg8[%c40, %c0_35] : memref<128x128xf32, #tpu.memory_space<vmem>>, vector<8x128xf32>
    %191 = arith.addf %189, %190 : vector<8x128xf32>
    %192 = arith.negf %191 : vector<8x128xf32>
    %193 = math.exp %192 : vector<8x128xf32>
    %cst_36 = arith.constant 1.000000e+00 : f32
    %194 = vector.broadcast %cst_36 : f32 to vector<8x128xf32>
    %195 = arith.addf %194, %193 : vector<8x128xf32>
    %196 = arith.divf %194, %195 : vector<8x128xf32>
    %197 = vector.extract_strided_slice %191 {offsets = [0, 64], sizes = [8, 32], strides = [1, 1]} : vector<8x128xf32> to vector<8x32xf32>
    %198 = math.tanh %197 : vector<8x32xf32>
    %199 = vector.extract_strided_slice %196 {offsets = [0, 32], sizes = [8, 32], strides = [1, 1]} : vector<8x128xf32> to vector<8x32xf32>
    %200 = arith.mulf %199, %165 : vector<8x32xf32>
    %201 = vector.extract_strided_slice %196 {offsets = [0, 0], sizes = [8, 32], strides = [1, 1]} : vector<8x128xf32> to vector<8x32xf32>
    %202 = arith.mulf %201, %198 : vector<8x32xf32>
    %203 = arith.addf %200, %202 : vector<8x32xf32>
    %204 = vector.extract_strided_slice %196 {offsets = [0, 96], sizes = [8, 32], strides = [1, 1]} : vector<8x128xf32> to vector<8x32xf32>
    %205 = math.tanh %203 : vector<8x32xf32>
    %206 = arith.mulf %204, %205 : vector<8x32xf32>
    %207 = vector.extract_strided_slice %188 {offsets = [0, 128], sizes = [8, 128], strides = [1, 1]} : vector<8x256xf32> to vector<8x128xf32>
    %208 = arith.negf %207 : vector<8x128xf32>
    %209 = math.exp %208 : vector<8x128xf32>
    %cst_37 = arith.constant 1.000000e+00 : f32
    %210 = vector.broadcast %cst_37 : f32 to vector<8x128xf32>
    %211 = arith.addf %210, %209 : vector<8x128xf32>
    %212 = arith.divf %210, %211 : vector<8x128xf32>
    %213 = vector.extract_strided_slice %207 {offsets = [0, 64], sizes = [8, 32], strides = [1, 1]} : vector<8x128xf32> to vector<8x32xf32>
    %214 = math.tanh %213 : vector<8x32xf32>
    %215 = vector.extract_strided_slice %212 {offsets = [0, 32], sizes = [8, 32], strides = [1, 1]} : vector<8x128xf32> to vector<8x32xf32>
    %216 = arith.mulf %215, %181 : vector<8x32xf32>
    %217 = vector.extract_strided_slice %212 {offsets = [0, 0], sizes = [8, 32], strides = [1, 1]} : vector<8x128xf32> to vector<8x32xf32>
    %218 = arith.mulf %217, %214 : vector<8x32xf32>
    %219 = arith.addf %216, %218 : vector<8x32xf32>
    %220 = vector.extract_strided_slice %212 {offsets = [0, 96], sizes = [8, 32], strides = [1, 1]} : vector<8x128xf32> to vector<8x32xf32>
    %221 = math.tanh %219 : vector<8x32xf32>
    %222 = arith.mulf %220, %221 : vector<8x32xf32>
    %223 = tpu.concatenate %206, %222 in 1 : vector<8x32xf32>, vector<8x32xf32> -> vector<8x64xf32>
    %cst_38 = arith.constant dense<0.000000e+00> : vector<8x256xf32>
    %224 = tpu.matmul %223, %5, %cst_38 {dimension_numbers = #tpu.dot_dimension_numbers<[1], [0], [0], [1], [0, 0, 1, 1], [], []>} : vector<8x64xf32>, vector<64x256xf32>, vector<8x256xf32> -> vector<8x256xf32>
    %225 = vector.broadcast %6 : vector<1x256xf32> to vector<8x256xf32>
    %226 = arith.addf %224, %225 : vector<8x256xf32>
    %227 = vector.extract_strided_slice %226 {offsets = [0, 0], sizes = [8, 128], strides = [1, 1]} : vector<8x256xf32> to vector<8x128xf32>
    %c48 = arith.constant 48 : index
    %c0_39 = arith.constant 0 : index
    %228 = vector.load %arg8[%c48, %c0_39] : memref<128x128xf32, #tpu.memory_space<vmem>>, vector<8x128xf32>
    %229 = arith.addf %227, %228 : vector<8x128xf32>
    %230 = arith.negf %229 : vector<8x128xf32>
    %231 = math.exp %230 : vector<8x128xf32>
    %cst_40 = arith.constant 1.000000e+00 : f32
    %232 = vector.broadcast %cst_40 : f32 to vector<8x128xf32>
    %233 = arith.addf %232, %231 : vector<8x128xf32>
    %234 = arith.divf %232, %233 : vector<8x128xf32>
    %235 = vector.extract_strided_slice %229 {offsets = [0, 64], sizes = [8, 32], strides = [1, 1]} : vector<8x128xf32> to vector<8x32xf32>
    %236 = math.tanh %235 : vector<8x32xf32>
    %237 = vector.extract_strided_slice %234 {offsets = [0, 32], sizes = [8, 32], strides = [1, 1]} : vector<8x128xf32> to vector<8x32xf32>
    %238 = arith.mulf %237, %203 : vector<8x32xf32>
    %239 = vector.extract_strided_slice %234 {offsets = [0, 0], sizes = [8, 32], strides = [1, 1]} : vector<8x128xf32> to vector<8x32xf32>
    %240 = arith.mulf %239, %236 : vector<8x32xf32>
    %241 = arith.addf %238, %240 : vector<8x32xf32>
    %242 = vector.extract_strided_slice %234 {offsets = [0, 96], sizes = [8, 32], strides = [1, 1]} : vector<8x128xf32> to vector<8x32xf32>
    %243 = math.tanh %241 : vector<8x32xf32>
    %244 = arith.mulf %242, %243 : vector<8x32xf32>
    %245 = vector.extract_strided_slice %226 {offsets = [0, 128], sizes = [8, 128], strides = [1, 1]} : vector<8x256xf32> to vector<8x128xf32>
    %246 = arith.negf %245 : vector<8x128xf32>
    %247 = math.exp %246 : vector<8x128xf32>
    %cst_41 = arith.constant 1.000000e+00 : f32
    %248 = vector.broadcast %cst_41 : f32 to vector<8x128xf32>
    %249 = arith.addf %248, %247 : vector<8x128xf32>
    %250 = arith.divf %248, %249 : vector<8x128xf32>
    %251 = vector.extract_strided_slice %245 {offsets = [0, 64], sizes = [8, 32], strides = [1, 1]} : vector<8x128xf32> to vector<8x32xf32>
    %252 = math.tanh %251 : vector<8x32xf32>
    %253 = vector.extract_strided_slice %250 {offsets = [0, 32], sizes = [8, 32], strides = [1, 1]} : vector<8x128xf32> to vector<8x32xf32>
    %254 = arith.mulf %253, %219 : vector<8x32xf32>
    %255 = vector.extract_strided_slice %250 {offsets = [0, 0], sizes = [8, 32], strides = [1, 1]} : vector<8x128xf32> to vector<8x32xf32>
    %256 = arith.mulf %255, %252 : vector<8x32xf32>
    %257 = arith.addf %254, %256 : vector<8x32xf32>
    %258 = vector.extract_strided_slice %250 {offsets = [0, 96], sizes = [8, 32], strides = [1, 1]} : vector<8x128xf32> to vector<8x32xf32>
    %259 = math.tanh %257 : vector<8x32xf32>
    %260 = arith.mulf %258, %259 : vector<8x32xf32>
    %261 = tpu.concatenate %244, %260 in 1 : vector<8x32xf32>, vector<8x32xf32> -> vector<8x64xf32>
    %cst_42 = arith.constant dense<0.000000e+00> : vector<8x256xf32>
    %262 = tpu.matmul %261, %5, %cst_42 {dimension_numbers = #tpu.dot_dimension_numbers<[1], [0], [0], [1], [0, 0, 1, 1], [], []>} : vector<8x64xf32>, vector<64x256xf32>, vector<8x256xf32> -> vector<8x256xf32>
    %263 = vector.broadcast %6 : vector<1x256xf32> to vector<8x256xf32>
    %264 = arith.addf %262, %263 : vector<8x256xf32>
    %265 = vector.extract_strided_slice %264 {offsets = [0, 0], sizes = [8, 128], strides = [1, 1]} : vector<8x256xf32> to vector<8x128xf32>
    %c56 = arith.constant 56 : index
    %c0_43 = arith.constant 0 : index
    %266 = vector.load %arg8[%c56, %c0_43] : memref<128x128xf32, #tpu.memory_space<vmem>>, vector<8x128xf32>
    %267 = arith.addf %265, %266 : vector<8x128xf32>
    %268 = arith.negf %267 : vector<8x128xf32>
    %269 = math.exp %268 : vector<8x128xf32>
    %cst_44 = arith.constant 1.000000e+00 : f32
    %270 = vector.broadcast %cst_44 : f32 to vector<8x128xf32>
    %271 = arith.addf %270, %269 : vector<8x128xf32>
    %272 = arith.divf %270, %271 : vector<8x128xf32>
    %273 = vector.extract_strided_slice %267 {offsets = [0, 64], sizes = [8, 32], strides = [1, 1]} : vector<8x128xf32> to vector<8x32xf32>
    %274 = math.tanh %273 : vector<8x32xf32>
    %275 = vector.extract_strided_slice %272 {offsets = [0, 32], sizes = [8, 32], strides = [1, 1]} : vector<8x128xf32> to vector<8x32xf32>
    %276 = arith.mulf %275, %241 : vector<8x32xf32>
    %277 = vector.extract_strided_slice %272 {offsets = [0, 0], sizes = [8, 32], strides = [1, 1]} : vector<8x128xf32> to vector<8x32xf32>
    %278 = arith.mulf %277, %274 : vector<8x32xf32>
    %279 = arith.addf %276, %278 : vector<8x32xf32>
    %280 = vector.extract_strided_slice %272 {offsets = [0, 96], sizes = [8, 32], strides = [1, 1]} : vector<8x128xf32> to vector<8x32xf32>
    %281 = math.tanh %279 : vector<8x32xf32>
    %282 = arith.mulf %280, %281 : vector<8x32xf32>
    %283 = vector.extract_strided_slice %264 {offsets = [0, 128], sizes = [8, 128], strides = [1, 1]} : vector<8x256xf32> to vector<8x128xf32>
    %284 = arith.negf %283 : vector<8x128xf32>
    %285 = math.exp %284 : vector<8x128xf32>
    %cst_45 = arith.constant 1.000000e+00 : f32
    %286 = vector.broadcast %cst_45 : f32 to vector<8x128xf32>
    %287 = arith.addf %286, %285 : vector<8x128xf32>
    %288 = arith.divf %286, %287 : vector<8x128xf32>
    %289 = vector.extract_strided_slice %283 {offsets = [0, 64], sizes = [8, 32], strides = [1, 1]} : vector<8x128xf32> to vector<8x32xf32>
    %290 = math.tanh %289 : vector<8x32xf32>
    %291 = vector.extract_strided_slice %288 {offsets = [0, 32], sizes = [8, 32], strides = [1, 1]} : vector<8x128xf32> to vector<8x32xf32>
    %292 = arith.mulf %291, %257 : vector<8x32xf32>
    %293 = vector.extract_strided_slice %288 {offsets = [0, 0], sizes = [8, 32], strides = [1, 1]} : vector<8x128xf32> to vector<8x32xf32>
    %294 = arith.mulf %293, %290 : vector<8x32xf32>
    %295 = arith.addf %292, %294 : vector<8x32xf32>
    %296 = vector.extract_strided_slice %288 {offsets = [0, 96], sizes = [8, 32], strides = [1, 1]} : vector<8x128xf32> to vector<8x32xf32>
    %297 = math.tanh %295 : vector<8x32xf32>
    %298 = arith.mulf %296, %297 : vector<8x32xf32>
    %299 = tpu.concatenate %282, %298 in 1 : vector<8x32xf32>, vector<8x32xf32> -> vector<8x64xf32>
    %cst_46 = arith.constant dense<0.000000e+00> : vector<8x256xf32>
    %300 = tpu.matmul %299, %5, %cst_46 {dimension_numbers = #tpu.dot_dimension_numbers<[1], [0], [0], [1], [0, 0, 1, 1], [], []>} : vector<8x64xf32>, vector<64x256xf32>, vector<8x256xf32> -> vector<8x256xf32>
    %301 = vector.broadcast %6 : vector<1x256xf32> to vector<8x256xf32>
    %302 = arith.addf %300, %301 : vector<8x256xf32>
    %303 = vector.extract_strided_slice %302 {offsets = [0, 0], sizes = [8, 128], strides = [1, 1]} : vector<8x256xf32> to vector<8x128xf32>
    %c64 = arith.constant 64 : index
    %c0_47 = arith.constant 0 : index
    %304 = vector.load %arg8[%c64, %c0_47] : memref<128x128xf32, #tpu.memory_space<vmem>>, vector<8x128xf32>
    %305 = arith.addf %303, %304 : vector<8x128xf32>
    %306 = arith.negf %305 : vector<8x128xf32>
    %307 = math.exp %306 : vector<8x128xf32>
    %cst_48 = arith.constant 1.000000e+00 : f32
    %308 = vector.broadcast %cst_48 : f32 to vector<8x128xf32>
    %309 = arith.addf %308, %307 : vector<8x128xf32>
    %310 = arith.divf %308, %309 : vector<8x128xf32>
    %311 = vector.extract_strided_slice %305 {offsets = [0, 64], sizes = [8, 32], strides = [1, 1]} : vector<8x128xf32> to vector<8x32xf32>
    %312 = math.tanh %311 : vector<8x32xf32>
    %313 = vector.extract_strided_slice %310 {offsets = [0, 32], sizes = [8, 32], strides = [1, 1]} : vector<8x128xf32> to vector<8x32xf32>
    %314 = arith.mulf %313, %279 : vector<8x32xf32>
    %315 = vector.extract_strided_slice %310 {offsets = [0, 0], sizes = [8, 32], strides = [1, 1]} : vector<8x128xf32> to vector<8x32xf32>
    %316 = arith.mulf %315, %312 : vector<8x32xf32>
    %317 = arith.addf %314, %316 : vector<8x32xf32>
    %318 = vector.extract_strided_slice %310 {offsets = [0, 96], sizes = [8, 32], strides = [1, 1]} : vector<8x128xf32> to vector<8x32xf32>
    %319 = math.tanh %317 : vector<8x32xf32>
    %320 = arith.mulf %318, %319 : vector<8x32xf32>
    %321 = vector.extract_strided_slice %302 {offsets = [0, 128], sizes = [8, 128], strides = [1, 1]} : vector<8x256xf32> to vector<8x128xf32>
    %322 = arith.negf %321 : vector<8x128xf32>
    %323 = math.exp %322 : vector<8x128xf32>
    %cst_49 = arith.constant 1.000000e+00 : f32
    %324 = vector.broadcast %cst_49 : f32 to vector<8x128xf32>
    %325 = arith.addf %324, %323 : vector<8x128xf32>
    %326 = arith.divf %324, %325 : vector<8x128xf32>
    %327 = vector.extract_strided_slice %321 {offsets = [0, 64], sizes = [8, 32], strides = [1, 1]} : vector<8x128xf32> to vector<8x32xf32>
    %328 = math.tanh %327 : vector<8x32xf32>
    %329 = vector.extract_strided_slice %326 {offsets = [0, 32], sizes = [8, 32], strides = [1, 1]} : vector<8x128xf32> to vector<8x32xf32>
    %330 = arith.mulf %329, %295 : vector<8x32xf32>
    %331 = vector.extract_strided_slice %326 {offsets = [0, 0], sizes = [8, 32], strides = [1, 1]} : vector<8x128xf32> to vector<8x32xf32>
    %332 = arith.mulf %331, %328 : vector<8x32xf32>
    %333 = arith.addf %330, %332 : vector<8x32xf32>
    %334 = vector.extract_strided_slice %326 {offsets = [0, 96], sizes = [8, 32], strides = [1, 1]} : vector<8x128xf32> to vector<8x32xf32>
    %335 = math.tanh %333 : vector<8x32xf32>
    %336 = arith.mulf %334, %335 : vector<8x32xf32>
    %337 = tpu.concatenate %320, %336 in 1 : vector<8x32xf32>, vector<8x32xf32> -> vector<8x64xf32>
    %cst_50 = arith.constant dense<0.000000e+00> : vector<8x256xf32>
    %338 = tpu.matmul %337, %5, %cst_50 {dimension_numbers = #tpu.dot_dimension_numbers<[1], [0], [0], [1], [0, 0, 1, 1], [], []>} : vector<8x64xf32>, vector<64x256xf32>, vector<8x256xf32> -> vector<8x256xf32>
    %339 = vector.broadcast %6 : vector<1x256xf32> to vector<8x256xf32>
    %340 = arith.addf %338, %339 : vector<8x256xf32>
    %341 = vector.extract_strided_slice %340 {offsets = [0, 0], sizes = [8, 128], strides = [1, 1]} : vector<8x256xf32> to vector<8x128xf32>
    %c72 = arith.constant 72 : index
    %c0_51 = arith.constant 0 : index
    %342 = vector.load %arg8[%c72, %c0_51] : memref<128x128xf32, #tpu.memory_space<vmem>>, vector<8x128xf32>
    %343 = arith.addf %341, %342 : vector<8x128xf32>
    %344 = arith.negf %343 : vector<8x128xf32>
    %345 = math.exp %344 : vector<8x128xf32>
    %cst_52 = arith.constant 1.000000e+00 : f32
    %346 = vector.broadcast %cst_52 : f32 to vector<8x128xf32>
    %347 = arith.addf %346, %345 : vector<8x128xf32>
    %348 = arith.divf %346, %347 : vector<8x128xf32>
    %349 = vector.extract_strided_slice %343 {offsets = [0, 64], sizes = [8, 32], strides = [1, 1]} : vector<8x128xf32> to vector<8x32xf32>
    %350 = math.tanh %349 : vector<8x32xf32>
    %351 = vector.extract_strided_slice %348 {offsets = [0, 32], sizes = [8, 32], strides = [1, 1]} : vector<8x128xf32> to vector<8x32xf32>
    %352 = arith.mulf %351, %317 : vector<8x32xf32>
    %353 = vector.extract_strided_slice %348 {offsets = [0, 0], sizes = [8, 32], strides = [1, 1]} : vector<8x128xf32> to vector<8x32xf32>
    %354 = arith.mulf %353, %350 : vector<8x32xf32>
    %355 = arith.addf %352, %354 : vector<8x32xf32>
    %356 = vector.extract_strided_slice %348 {offsets = [0, 96], sizes = [8, 32], strides = [1, 1]} : vector<8x128xf32> to vector<8x32xf32>
    %357 = math.tanh %355 : vector<8x32xf32>
    %358 = arith.mulf %356, %357 : vector<8x32xf32>
    %359 = vector.extract_strided_slice %340 {offsets = [0, 128], sizes = [8, 128], strides = [1, 1]} : vector<8x256xf32> to vector<8x128xf32>
    %360 = arith.negf %359 : vector<8x128xf32>
    %361 = math.exp %360 : vector<8x128xf32>
    %cst_53 = arith.constant 1.000000e+00 : f32
    %362 = vector.broadcast %cst_53 : f32 to vector<8x128xf32>
    %363 = arith.addf %362, %361 : vector<8x128xf32>
    %364 = arith.divf %362, %363 : vector<8x128xf32>
    %365 = vector.extract_strided_slice %359 {offsets = [0, 64], sizes = [8, 32], strides = [1, 1]} : vector<8x128xf32> to vector<8x32xf32>
    %366 = math.tanh %365 : vector<8x32xf32>
    %367 = vector.extract_strided_slice %364 {offsets = [0, 32], sizes = [8, 32], strides = [1, 1]} : vector<8x128xf32> to vector<8x32xf32>
    %368 = arith.mulf %367, %333 : vector<8x32xf32>
    %369 = vector.extract_strided_slice %364 {offsets = [0, 0], sizes = [8, 32], strides = [1, 1]} : vector<8x128xf32> to vector<8x32xf32>
    %370 = arith.mulf %369, %366 : vector<8x32xf32>
    %371 = arith.addf %368, %370 : vector<8x32xf32>
    %372 = vector.extract_strided_slice %364 {offsets = [0, 96], sizes = [8, 32], strides = [1, 1]} : vector<8x128xf32> to vector<8x32xf32>
    %373 = math.tanh %371 : vector<8x32xf32>
    %374 = arith.mulf %372, %373 : vector<8x32xf32>
    %375 = tpu.concatenate %358, %374 in 1 : vector<8x32xf32>, vector<8x32xf32> -> vector<8x64xf32>
    %cst_54 = arith.constant dense<0.000000e+00> : vector<8x256xf32>
    %376 = tpu.matmul %375, %5, %cst_54 {dimension_numbers = #tpu.dot_dimension_numbers<[1], [0], [0], [1], [0, 0, 1, 1], [], []>} : vector<8x64xf32>, vector<64x256xf32>, vector<8x256xf32> -> vector<8x256xf32>
    %377 = vector.broadcast %6 : vector<1x256xf32> to vector<8x256xf32>
    %378 = arith.addf %376, %377 : vector<8x256xf32>
    %379 = vector.extract_strided_slice %378 {offsets = [0, 0], sizes = [8, 128], strides = [1, 1]} : vector<8x256xf32> to vector<8x128xf32>
    %c80 = arith.constant 80 : index
    %c0_55 = arith.constant 0 : index
    %380 = vector.load %arg8[%c80, %c0_55] : memref<128x128xf32, #tpu.memory_space<vmem>>, vector<8x128xf32>
    %381 = arith.addf %379, %380 : vector<8x128xf32>
    %382 = arith.negf %381 : vector<8x128xf32>
    %383 = math.exp %382 : vector<8x128xf32>
    %cst_56 = arith.constant 1.000000e+00 : f32
    %384 = vector.broadcast %cst_56 : f32 to vector<8x128xf32>
    %385 = arith.addf %384, %383 : vector<8x128xf32>
    %386 = arith.divf %384, %385 : vector<8x128xf32>
    %387 = vector.extract_strided_slice %381 {offsets = [0, 64], sizes = [8, 32], strides = [1, 1]} : vector<8x128xf32> to vector<8x32xf32>
    %388 = math.tanh %387 : vector<8x32xf32>
    %389 = vector.extract_strided_slice %386 {offsets = [0, 32], sizes = [8, 32], strides = [1, 1]} : vector<8x128xf32> to vector<8x32xf32>
    %390 = arith.mulf %389, %355 : vector<8x32xf32>
    %391 = vector.extract_strided_slice %386 {offsets = [0, 0], sizes = [8, 32], strides = [1, 1]} : vector<8x128xf32> to vector<8x32xf32>
    %392 = arith.mulf %391, %388 : vector<8x32xf32>
    %393 = arith.addf %390, %392 : vector<8x32xf32>
    %394 = vector.extract_strided_slice %386 {offsets = [0, 96], sizes = [8, 32], strides = [1, 1]} : vector<8x128xf32> to vector<8x32xf32>
    %395 = math.tanh %393 : vector<8x32xf32>
    %396 = arith.mulf %394, %395 : vector<8x32xf32>
    %397 = vector.extract_strided_slice %378 {offsets = [0, 128], sizes = [8, 128], strides = [1, 1]} : vector<8x256xf32> to vector<8x128xf32>
    %398 = arith.negf %397 : vector<8x128xf32>
    %399 = math.exp %398 : vector<8x128xf32>
    %cst_57 = arith.constant 1.000000e+00 : f32
    %400 = vector.broadcast %cst_57 : f32 to vector<8x128xf32>
    %401 = arith.addf %400, %399 : vector<8x128xf32>
    %402 = arith.divf %400, %401 : vector<8x128xf32>
    %403 = vector.extract_strided_slice %397 {offsets = [0, 64], sizes = [8, 32], strides = [1, 1]} : vector<8x128xf32> to vector<8x32xf32>
    %404 = math.tanh %403 : vector<8x32xf32>
    %405 = vector.extract_strided_slice %402 {offsets = [0, 32], sizes = [8, 32], strides = [1, 1]} : vector<8x128xf32> to vector<8x32xf32>
    %406 = arith.mulf %405, %371 : vector<8x32xf32>
    %407 = vector.extract_strided_slice %402 {offsets = [0, 0], sizes = [8, 32], strides = [1, 1]} : vector<8x128xf32> to vector<8x32xf32>
    %408 = arith.mulf %407, %404 : vector<8x32xf32>
    %409 = arith.addf %406, %408 : vector<8x32xf32>
    %410 = vector.extract_strided_slice %402 {offsets = [0, 96], sizes = [8, 32], strides = [1, 1]} : vector<8x128xf32> to vector<8x32xf32>
    %411 = math.tanh %409 : vector<8x32xf32>
    %412 = arith.mulf %410, %411 : vector<8x32xf32>
    %413 = tpu.concatenate %396, %412 in 1 : vector<8x32xf32>, vector<8x32xf32> -> vector<8x64xf32>
    %cst_58 = arith.constant dense<0.000000e+00> : vector<8x256xf32>
    %414 = tpu.matmul %413, %5, %cst_58 {dimension_numbers = #tpu.dot_dimension_numbers<[1], [0], [0], [1], [0, 0, 1, 1], [], []>} : vector<8x64xf32>, vector<64x256xf32>, vector<8x256xf32> -> vector<8x256xf32>
    %415 = vector.broadcast %6 : vector<1x256xf32> to vector<8x256xf32>
    %416 = arith.addf %414, %415 : vector<8x256xf32>
    %417 = vector.extract_strided_slice %416 {offsets = [0, 0], sizes = [8, 128], strides = [1, 1]} : vector<8x256xf32> to vector<8x128xf32>
    %c88 = arith.constant 88 : index
    %c0_59 = arith.constant 0 : index
    %418 = vector.load %arg8[%c88, %c0_59] : memref<128x128xf32, #tpu.memory_space<vmem>>, vector<8x128xf32>
    %419 = arith.addf %417, %418 : vector<8x128xf32>
    %420 = arith.negf %419 : vector<8x128xf32>
    %421 = math.exp %420 : vector<8x128xf32>
    %cst_60 = arith.constant 1.000000e+00 : f32
    %422 = vector.broadcast %cst_60 : f32 to vector<8x128xf32>
    %423 = arith.addf %422, %421 : vector<8x128xf32>
    %424 = arith.divf %422, %423 : vector<8x128xf32>
    %425 = vector.extract_strided_slice %419 {offsets = [0, 64], sizes = [8, 32], strides = [1, 1]} : vector<8x128xf32> to vector<8x32xf32>
    %426 = math.tanh %425 : vector<8x32xf32>
    %427 = vector.extract_strided_slice %424 {offsets = [0, 32], sizes = [8, 32], strides = [1, 1]} : vector<8x128xf32> to vector<8x32xf32>
    %428 = arith.mulf %427, %393 : vector<8x32xf32>
    %429 = vector.extract_strided_slice %424 {offsets = [0, 0], sizes = [8, 32], strides = [1, 1]} : vector<8x128xf32> to vector<8x32xf32>
    %430 = arith.mulf %429, %426 : vector<8x32xf32>
    %431 = arith.addf %428, %430 : vector<8x32xf32>
    %432 = vector.extract_strided_slice %424 {offsets = [0, 96], sizes = [8, 32], strides = [1, 1]} : vector<8x128xf32> to vector<8x32xf32>
    %433 = math.tanh %431 : vector<8x32xf32>
    %434 = arith.mulf %432, %433 : vector<8x32xf32>
    %435 = vector.extract_strided_slice %416 {offsets = [0, 128], sizes = [8, 128], strides = [1, 1]} : vector<8x256xf32> to vector<8x128xf32>
    %436 = arith.negf %435 : vector<8x128xf32>
    %437 = math.exp %436 : vector<8x128xf32>
    %cst_61 = arith.constant 1.000000e+00 : f32
    %438 = vector.broadcast %cst_61 : f32 to vector<8x128xf32>
    %439 = arith.addf %438, %437 : vector<8x128xf32>
    %440 = arith.divf %438, %439 : vector<8x128xf32>
    %441 = vector.extract_strided_slice %435 {offsets = [0, 64], sizes = [8, 32], strides = [1, 1]} : vector<8x128xf32> to vector<8x32xf32>
    %442 = math.tanh %441 : vector<8x32xf32>
    %443 = vector.extract_strided_slice %440 {offsets = [0, 32], sizes = [8, 32], strides = [1, 1]} : vector<8x128xf32> to vector<8x32xf32>
    %444 = arith.mulf %443, %409 : vector<8x32xf32>
    %445 = vector.extract_strided_slice %440 {offsets = [0, 0], sizes = [8, 32], strides = [1, 1]} : vector<8x128xf32> to vector<8x32xf32>
    %446 = arith.mulf %445, %442 : vector<8x32xf32>
    %447 = arith.addf %444, %446 : vector<8x32xf32>
    %448 = vector.extract_strided_slice %440 {offsets = [0, 96], sizes = [8, 32], strides = [1, 1]} : vector<8x128xf32> to vector<8x32xf32>
    %449 = math.tanh %447 : vector<8x32xf32>
    %450 = arith.mulf %448, %449 : vector<8x32xf32>
    %451 = tpu.concatenate %434, %450 in 1 : vector<8x32xf32>, vector<8x32xf32> -> vector<8x64xf32>
    %cst_62 = arith.constant dense<0.000000e+00> : vector<8x256xf32>
    %452 = tpu.matmul %451, %5, %cst_62 {dimension_numbers = #tpu.dot_dimension_numbers<[1], [0], [0], [1], [0, 0, 1, 1], [], []>} : vector<8x64xf32>, vector<64x256xf32>, vector<8x256xf32> -> vector<8x256xf32>
    %453 = vector.broadcast %6 : vector<1x256xf32> to vector<8x256xf32>
    %454 = arith.addf %452, %453 : vector<8x256xf32>
    %455 = vector.extract_strided_slice %454 {offsets = [0, 0], sizes = [8, 128], strides = [1, 1]} : vector<8x256xf32> to vector<8x128xf32>
    %c96 = arith.constant 96 : index
    %c0_63 = arith.constant 0 : index
    %456 = vector.load %arg8[%c96, %c0_63] : memref<128x128xf32, #tpu.memory_space<vmem>>, vector<8x128xf32>
    %457 = arith.addf %455, %456 : vector<8x128xf32>
    %458 = arith.negf %457 : vector<8x128xf32>
    %459 = math.exp %458 : vector<8x128xf32>
    %cst_64 = arith.constant 1.000000e+00 : f32
    %460 = vector.broadcast %cst_64 : f32 to vector<8x128xf32>
    %461 = arith.addf %460, %459 : vector<8x128xf32>
    %462 = arith.divf %460, %461 : vector<8x128xf32>
    %463 = vector.extract_strided_slice %457 {offsets = [0, 64], sizes = [8, 32], strides = [1, 1]} : vector<8x128xf32> to vector<8x32xf32>
    %464 = math.tanh %463 : vector<8x32xf32>
    %465 = vector.extract_strided_slice %462 {offsets = [0, 32], sizes = [8, 32], strides = [1, 1]} : vector<8x128xf32> to vector<8x32xf32>
    %466 = arith.mulf %465, %431 : vector<8x32xf32>
    %467 = vector.extract_strided_slice %462 {offsets = [0, 0], sizes = [8, 32], strides = [1, 1]} : vector<8x128xf32> to vector<8x32xf32>
    %468 = arith.mulf %467, %464 : vector<8x32xf32>
    %469 = arith.addf %466, %468 : vector<8x32xf32>
    %470 = vector.extract_strided_slice %462 {offsets = [0, 96], sizes = [8, 32], strides = [1, 1]} : vector<8x128xf32> to vector<8x32xf32>
    %471 = math.tanh %469 : vector<8x32xf32>
    %472 = arith.mulf %470, %471 : vector<8x32xf32>
    %473 = vector.extract_strided_slice %454 {offsets = [0, 128], sizes = [8, 128], strides = [1, 1]} : vector<8x256xf32> to vector<8x128xf32>
    %474 = arith.negf %473 : vector<8x128xf32>
    %475 = math.exp %474 : vector<8x128xf32>
    %cst_65 = arith.constant 1.000000e+00 : f32
    %476 = vector.broadcast %cst_65 : f32 to vector<8x128xf32>
    %477 = arith.addf %476, %475 : vector<8x128xf32>
    %478 = arith.divf %476, %477 : vector<8x128xf32>
    %479 = vector.extract_strided_slice %473 {offsets = [0, 64], sizes = [8, 32], strides = [1, 1]} : vector<8x128xf32> to vector<8x32xf32>
    %480 = math.tanh %479 : vector<8x32xf32>
    %481 = vector.extract_strided_slice %478 {offsets = [0, 32], sizes = [8, 32], strides = [1, 1]} : vector<8x128xf32> to vector<8x32xf32>
    %482 = arith.mulf %481, %447 : vector<8x32xf32>
    %483 = vector.extract_strided_slice %478 {offsets = [0, 0], sizes = [8, 32], strides = [1, 1]} : vector<8x128xf32> to vector<8x32xf32>
    %484 = arith.mulf %483, %480 : vector<8x32xf32>
    %485 = arith.addf %482, %484 : vector<8x32xf32>
    %486 = vector.extract_strided_slice %478 {offsets = [0, 96], sizes = [8, 32], strides = [1, 1]} : vector<8x128xf32> to vector<8x32xf32>
    %487 = math.tanh %485 : vector<8x32xf32>
    %488 = arith.mulf %486, %487 : vector<8x32xf32>
    %489 = tpu.concatenate %472, %488 in 1 : vector<8x32xf32>, vector<8x32xf32> -> vector<8x64xf32>
    %cst_66 = arith.constant dense<0.000000e+00> : vector<8x256xf32>
    %490 = tpu.matmul %489, %5, %cst_66 {dimension_numbers = #tpu.dot_dimension_numbers<[1], [0], [0], [1], [0, 0, 1, 1], [], []>} : vector<8x64xf32>, vector<64x256xf32>, vector<8x256xf32> -> vector<8x256xf32>
    %491 = vector.broadcast %6 : vector<1x256xf32> to vector<8x256xf32>
    %492 = arith.addf %490, %491 : vector<8x256xf32>
    %493 = vector.extract_strided_slice %492 {offsets = [0, 0], sizes = [8, 128], strides = [1, 1]} : vector<8x256xf32> to vector<8x128xf32>
    %c104 = arith.constant 104 : index
    %c0_67 = arith.constant 0 : index
    %494 = vector.load %arg8[%c104, %c0_67] : memref<128x128xf32, #tpu.memory_space<vmem>>, vector<8x128xf32>
    %495 = arith.addf %493, %494 : vector<8x128xf32>
    %496 = arith.negf %495 : vector<8x128xf32>
    %497 = math.exp %496 : vector<8x128xf32>
    %cst_68 = arith.constant 1.000000e+00 : f32
    %498 = vector.broadcast %cst_68 : f32 to vector<8x128xf32>
    %499 = arith.addf %498, %497 : vector<8x128xf32>
    %500 = arith.divf %498, %499 : vector<8x128xf32>
    %501 = vector.extract_strided_slice %495 {offsets = [0, 64], sizes = [8, 32], strides = [1, 1]} : vector<8x128xf32> to vector<8x32xf32>
    %502 = math.tanh %501 : vector<8x32xf32>
    %503 = vector.extract_strided_slice %500 {offsets = [0, 32], sizes = [8, 32], strides = [1, 1]} : vector<8x128xf32> to vector<8x32xf32>
    %504 = arith.mulf %503, %469 : vector<8x32xf32>
    %505 = vector.extract_strided_slice %500 {offsets = [0, 0], sizes = [8, 32], strides = [1, 1]} : vector<8x128xf32> to vector<8x32xf32>
    %506 = arith.mulf %505, %502 : vector<8x32xf32>
    %507 = arith.addf %504, %506 : vector<8x32xf32>
    %508 = vector.extract_strided_slice %500 {offsets = [0, 96], sizes = [8, 32], strides = [1, 1]} : vector<8x128xf32> to vector<8x32xf32>
    %509 = math.tanh %507 : vector<8x32xf32>
    %510 = arith.mulf %508, %509 : vector<8x32xf32>
    %511 = vector.extract_strided_slice %492 {offsets = [0, 128], sizes = [8, 128], strides = [1, 1]} : vector<8x256xf32> to vector<8x128xf32>
    %512 = arith.negf %511 : vector<8x128xf32>
    %513 = math.exp %512 : vector<8x128xf32>
    %cst_69 = arith.constant 1.000000e+00 : f32
    %514 = vector.broadcast %cst_69 : f32 to vector<8x128xf32>
    %515 = arith.addf %514, %513 : vector<8x128xf32>
    %516 = arith.divf %514, %515 : vector<8x128xf32>
    %517 = vector.extract_strided_slice %511 {offsets = [0, 64], sizes = [8, 32], strides = [1, 1]} : vector<8x128xf32> to vector<8x32xf32>
    %518 = math.tanh %517 : vector<8x32xf32>
    %519 = vector.extract_strided_slice %516 {offsets = [0, 32], sizes = [8, 32], strides = [1, 1]} : vector<8x128xf32> to vector<8x32xf32>
    %520 = arith.mulf %519, %485 : vector<8x32xf32>
    %521 = vector.extract_strided_slice %516 {offsets = [0, 0], sizes = [8, 32], strides = [1, 1]} : vector<8x128xf32> to vector<8x32xf32>
    %522 = arith.mulf %521, %518 : vector<8x32xf32>
    %523 = arith.addf %520, %522 : vector<8x32xf32>
    %524 = vector.extract_strided_slice %516 {offsets = [0, 96], sizes = [8, 32], strides = [1, 1]} : vector<8x128xf32> to vector<8x32xf32>
    %525 = math.tanh %523 : vector<8x32xf32>
    %526 = arith.mulf %524, %525 : vector<8x32xf32>
    %527 = tpu.concatenate %510, %526 in 1 : vector<8x32xf32>, vector<8x32xf32> -> vector<8x64xf32>
    %cst_70 = arith.constant dense<0.000000e+00> : vector<8x256xf32>
    %528 = tpu.matmul %527, %5, %cst_70 {dimension_numbers = #tpu.dot_dimension_numbers<[1], [0], [0], [1], [0, 0, 1, 1], [], []>} : vector<8x64xf32>, vector<64x256xf32>, vector<8x256xf32> -> vector<8x256xf32>
    %529 = vector.broadcast %6 : vector<1x256xf32> to vector<8x256xf32>
    %530 = arith.addf %528, %529 : vector<8x256xf32>
    %531 = vector.extract_strided_slice %530 {offsets = [0, 0], sizes = [8, 128], strides = [1, 1]} : vector<8x256xf32> to vector<8x128xf32>
    %c112 = arith.constant 112 : index
    %c0_71 = arith.constant 0 : index
    %532 = vector.load %arg8[%c112, %c0_71] : memref<128x128xf32, #tpu.memory_space<vmem>>, vector<8x128xf32>
    %533 = arith.addf %531, %532 : vector<8x128xf32>
    %534 = arith.negf %533 : vector<8x128xf32>
    %535 = math.exp %534 : vector<8x128xf32>
    %cst_72 = arith.constant 1.000000e+00 : f32
    %536 = vector.broadcast %cst_72 : f32 to vector<8x128xf32>
    %537 = arith.addf %536, %535 : vector<8x128xf32>
    %538 = arith.divf %536, %537 : vector<8x128xf32>
    %539 = vector.extract_strided_slice %533 {offsets = [0, 64], sizes = [8, 32], strides = [1, 1]} : vector<8x128xf32> to vector<8x32xf32>
    %540 = math.tanh %539 : vector<8x32xf32>
    %541 = vector.extract_strided_slice %538 {offsets = [0, 32], sizes = [8, 32], strides = [1, 1]} : vector<8x128xf32> to vector<8x32xf32>
    %542 = arith.mulf %541, %507 : vector<8x32xf32>
    %543 = vector.extract_strided_slice %538 {offsets = [0, 0], sizes = [8, 32], strides = [1, 1]} : vector<8x128xf32> to vector<8x32xf32>
    %544 = arith.mulf %543, %540 : vector<8x32xf32>
    %545 = arith.addf %542, %544 : vector<8x32xf32>
    %546 = vector.extract_strided_slice %538 {offsets = [0, 96], sizes = [8, 32], strides = [1, 1]} : vector<8x128xf32> to vector<8x32xf32>
    %547 = math.tanh %545 : vector<8x32xf32>
    %548 = arith.mulf %546, %547 : vector<8x32xf32>
    %549 = vector.extract_strided_slice %530 {offsets = [0, 128], sizes = [8, 128], strides = [1, 1]} : vector<8x256xf32> to vector<8x128xf32>
    %550 = arith.negf %549 : vector<8x128xf32>
    %551 = math.exp %550 : vector<8x128xf32>
    %cst_73 = arith.constant 1.000000e+00 : f32
    %552 = vector.broadcast %cst_73 : f32 to vector<8x128xf32>
    %553 = arith.addf %552, %551 : vector<8x128xf32>
    %554 = arith.divf %552, %553 : vector<8x128xf32>
    %555 = vector.extract_strided_slice %549 {offsets = [0, 64], sizes = [8, 32], strides = [1, 1]} : vector<8x128xf32> to vector<8x32xf32>
    %556 = math.tanh %555 : vector<8x32xf32>
    %557 = vector.extract_strided_slice %554 {offsets = [0, 32], sizes = [8, 32], strides = [1, 1]} : vector<8x128xf32> to vector<8x32xf32>
    %558 = arith.mulf %557, %523 : vector<8x32xf32>
    %559 = vector.extract_strided_slice %554 {offsets = [0, 0], sizes = [8, 32], strides = [1, 1]} : vector<8x128xf32> to vector<8x32xf32>
    %560 = arith.mulf %559, %556 : vector<8x32xf32>
    %561 = arith.addf %558, %560 : vector<8x32xf32>
    %562 = vector.extract_strided_slice %554 {offsets = [0, 96], sizes = [8, 32], strides = [1, 1]} : vector<8x128xf32> to vector<8x32xf32>
    %563 = math.tanh %561 : vector<8x32xf32>
    %564 = arith.mulf %562, %563 : vector<8x32xf32>
    %565 = tpu.concatenate %548, %564 in 1 : vector<8x32xf32>, vector<8x32xf32> -> vector<8x64xf32>
    %cst_74 = arith.constant dense<0.000000e+00> : vector<8x256xf32>
    %566 = tpu.matmul %565, %5, %cst_74 {dimension_numbers = #tpu.dot_dimension_numbers<[1], [0], [0], [1], [0, 0, 1, 1], [], []>} : vector<8x64xf32>, vector<64x256xf32>, vector<8x256xf32> -> vector<8x256xf32>
    %567 = vector.broadcast %6 : vector<1x256xf32> to vector<8x256xf32>
    %568 = arith.addf %566, %567 : vector<8x256xf32>
    %569 = vector.extract_strided_slice %568 {offsets = [0, 0], sizes = [8, 128], strides = [1, 1]} : vector<8x256xf32> to vector<8x128xf32>
    %c120 = arith.constant 120 : index
    %c0_75 = arith.constant 0 : index
    %570 = vector.load %arg8[%c120, %c0_75] : memref<128x128xf32, #tpu.memory_space<vmem>>, vector<8x128xf32>
    %571 = arith.addf %569, %570 : vector<8x128xf32>
    %572 = arith.negf %571 : vector<8x128xf32>
    %573 = math.exp %572 : vector<8x128xf32>
    %cst_76 = arith.constant 1.000000e+00 : f32
    %574 = vector.broadcast %cst_76 : f32 to vector<8x128xf32>
    %575 = arith.addf %574, %573 : vector<8x128xf32>
    %576 = arith.divf %574, %575 : vector<8x128xf32>
    %577 = vector.extract_strided_slice %571 {offsets = [0, 64], sizes = [8, 32], strides = [1, 1]} : vector<8x128xf32> to vector<8x32xf32>
    %578 = math.tanh %577 : vector<8x32xf32>
    %579 = vector.extract_strided_slice %576 {offsets = [0, 32], sizes = [8, 32], strides = [1, 1]} : vector<8x128xf32> to vector<8x32xf32>
    %580 = arith.mulf %579, %545 : vector<8x32xf32>
    %581 = vector.extract_strided_slice %576 {offsets = [0, 0], sizes = [8, 32], strides = [1, 1]} : vector<8x128xf32> to vector<8x32xf32>
    %582 = arith.mulf %581, %578 : vector<8x32xf32>
    %583 = arith.addf %580, %582 : vector<8x32xf32>
    %584 = vector.extract_strided_slice %576 {offsets = [0, 96], sizes = [8, 32], strides = [1, 1]} : vector<8x128xf32> to vector<8x32xf32>
    %585 = math.tanh %583 : vector<8x32xf32>
    %586 = arith.mulf %584, %585 : vector<8x32xf32>
    %587 = vector.extract_strided_slice %568 {offsets = [0, 128], sizes = [8, 128], strides = [1, 1]} : vector<8x256xf32> to vector<8x128xf32>
    %588 = arith.negf %587 : vector<8x128xf32>
    %589 = math.exp %588 : vector<8x128xf32>
    %cst_77 = arith.constant 1.000000e+00 : f32
    %590 = vector.broadcast %cst_77 : f32 to vector<8x128xf32>
    %591 = arith.addf %590, %589 : vector<8x128xf32>
    %592 = arith.divf %590, %591 : vector<8x128xf32>
    %593 = vector.extract_strided_slice %587 {offsets = [0, 64], sizes = [8, 32], strides = [1, 1]} : vector<8x128xf32> to vector<8x32xf32>
    %594 = math.tanh %593 : vector<8x32xf32>
    %595 = vector.extract_strided_slice %592 {offsets = [0, 32], sizes = [8, 32], strides = [1, 1]} : vector<8x128xf32> to vector<8x32xf32>
    %596 = arith.mulf %595, %561 : vector<8x32xf32>
    %597 = vector.extract_strided_slice %592 {offsets = [0, 0], sizes = [8, 32], strides = [1, 1]} : vector<8x128xf32> to vector<8x32xf32>
    %598 = arith.mulf %597, %594 : vector<8x32xf32>
    %599 = arith.addf %596, %598 : vector<8x32xf32>
    %600 = vector.extract_strided_slice %592 {offsets = [0, 96], sizes = [8, 32], strides = [1, 1]} : vector<8x128xf32> to vector<8x32xf32>
    %601 = math.tanh %599 : vector<8x32xf32>
    %602 = arith.mulf %600, %601 : vector<8x32xf32>
    %603 = tpu.concatenate %586, %602 in 1 : vector<8x32xf32>, vector<8x32xf32> -> vector<8x64xf32>
    %cst_78 = arith.constant dense<0.000000e+00> : vector<8x256xf32>
    %604 = tpu.matmul %603, %5, %cst_78 {dimension_numbers = #tpu.dot_dimension_numbers<[1], [0], [0], [1], [0, 0, 1, 1], [], []>} : vector<8x64xf32>, vector<64x256xf32>, vector<8x256xf32> -> vector<8x256xf32>
    %605 = vector.broadcast %6 : vector<1x256xf32> to vector<8x256xf32>
    %606 = arith.addf %604, %605 : vector<8x256xf32>
    %607 = vector.extract_strided_slice %606 {offsets = [0, 128], sizes = [8, 128], strides = [1, 1]} : vector<8x256xf32> to vector<8x128xf32>
    %608 = arith.negf %607 : vector<8x128xf32>
    %609 = math.exp %608 : vector<8x128xf32>
    %cst_79 = arith.constant 1.000000e+00 : f32
    %610 = vector.broadcast %cst_79 : f32 to vector<8x128xf32>
    %611 = arith.addf %610, %609 : vector<8x128xf32>
    %612 = arith.divf %610, %611 : vector<8x128xf32>
    %613 = vector.extract_strided_slice %607 {offsets = [0, 64], sizes = [8, 32], strides = [1, 1]} : vector<8x128xf32> to vector<8x32xf32>
    %614 = math.tanh %613 : vector<8x32xf32>
    %615 = vector.extract_strided_slice %612 {offsets = [0, 32], sizes = [8, 32], strides = [1, 1]} : vector<8x128xf32> to vector<8x32xf32>
    %616 = arith.mulf %615, %599 : vector<8x32xf32>
    %617 = vector.extract_strided_slice %612 {offsets = [0, 0], sizes = [8, 32], strides = [1, 1]} : vector<8x128xf32> to vector<8x32xf32>
    %618 = arith.mulf %617, %614 : vector<8x32xf32>
    %619 = arith.addf %616, %618 : vector<8x32xf32>
    %620 = vector.extract_strided_slice %612 {offsets = [0, 96], sizes = [8, 32], strides = [1, 1]} : vector<8x128xf32> to vector<8x32xf32>
    %621 = math.tanh %619 : vector<8x32xf32>
    %622 = arith.mulf %620, %621 : vector<8x32xf32>
    %c0_80 = arith.constant 0 : index
    %c0_81 = arith.constant 0 : index
    %623 = vector.load %arg5[%c0_80, %c0_81] : memref<32x128xf32, #tpu.memory_space<vmem>>, vector<32x128xf32>
    %cst_82 = arith.constant dense<0.000000e+00> : vector<8x128xf32>
    %624 = tpu.matmul %622, %623, %cst_82 {dimension_numbers = #tpu.dot_dimension_numbers<[1], [0], [0], [1], [0, 0, 1, 1], [], []>} : vector<8x32xf32>, vector<32x128xf32>, vector<8x128xf32> -> vector<8x128xf32>
    %c0_83 = arith.constant 0 : index
    %c0_84 = arith.constant 0 : index
    %625 = vector.load %arg6[%c0_83, %c0_84] : memref<1x128xf32, #tpu.memory_space<vmem>>, vector<1x128xf32>
    %626 = vector.broadcast %625 : vector<1x128xf32> to vector<8x128xf32>
    %627 = arith.addf %624, %626 : vector<8x128xf32>
    %c0_85 = arith.constant 0 : index
    %c0_86 = arith.constant 0 : index
    %c0_87 = arith.constant 0 : index
    %628 = vector.load %arg7[%c0_85, %c0_86, %c0_87] : memref<1x8x128xf32, #tpu.memory_space<vmem>>, vector<1x8x128xf32>
    %629 = vector.shape_cast %628 : vector<1x8x128xf32> to vector<8x128xf32>
    %630 = vector.shape_cast %627 : vector<8x128xf32> to vector<1x8x128xf32>
    tpu.vector_store %arg7[%c0_85, %c0_86, %c0_87], %630 {strides = array<i32>} : memref<1x8x128xf32, #tpu.memory_space<vmem>>, vector<1x8x128xf32>,
    return
  }
  func.func @transform_0(%arg0: i32) -> (i32, i32, i32) {
    %c0_i32 = arith.constant 0 : i32
    %c0_i32_0 = arith.constant 0 : i32
    %c0_i32_1 = arith.constant 0 : i32
    return %arg0, %c0_i32, %c0_i32_0 : i32, i32, i32
  }
  func.func @transform_1(%arg0: i32) -> (i32, i32) {
    %c0_i32 = arith.constant 0 : i32
    %c0_i32_0 = arith.constant 0 : i32
    %c0_i32_1 = arith.constant 0 : i32
    return %c0_i32, %c0_i32_0 : i32, i32
  }
  func.func @transform_2(%arg0: i32) -> (i32, i32) {
    %c0_i32 = arith.constant 0 : i32
    %c0_i32_0 = arith.constant 0 : i32
    %c0_i32_1 = arith.constant 0 : i32
    return %c0_i32, %c0_i32_0 : i32, i32
  }
  func.func @transform_3(%arg0: i32) -> (i32, i32) {
    %c0_i32 = arith.constant 0 : i32
    %c0_i32_0 = arith.constant 0 : i32
    %c0_i32_1 = arith.constant 0 : i32
    return %c0_i32, %c0_i32_0 : i32, i32
  }
  func.func @transform_4(%arg0: i32) -> (i32, i32) {
    %c0_i32 = arith.constant 0 : i32
    %c0_i32_0 = arith.constant 0 : i32
    %c0_i32_1 = arith.constant 0 : i32
    return %c0_i32, %c0_i32_0 : i32, i32
  }
  func.func @transform_5(%arg0: i32) -> (i32, i32) {
    %c0_i32 = arith.constant 0 : i32
    %c0_i32_0 = arith.constant 0 : i32
    %c0_i32_1 = arith.constant 0 : i32
    return %c0_i32, %c0_i32_0 : i32, i32
  }
  func.func @transform_6(%arg0: i32) -> (i32, i32, i32) {
    %c0_i32 = arith.constant 0 : i32
    %c0_i32_0 = arith.constant 0 : i32
    %c0_i32_1 = arith.constant 0 : i32
    return %arg0, %c0_i32, %c0_i32_0 : i32, i32, i32
  }
}

</mosaic_0001>

<bundles_post_ra>
// kernel: lstm_classifier_forward.1
= control target key start
LH: loop header
LB: loop body
LE: loop exit
PB: predicated region body
PF: predicated region fallthrough
CT: control target
= control target key end

     0   :  { %v3236_v3 = vmov 0.0   ;;  %vm89_vm0 = vcmask 1043456   ;;  %vm40_vm1 = vcmask 31744   ;;  %v272_v28 = vlaneseq  ;;  %s3237_s11 = smov 64   ;;  %s3827_s2 = inlined_call_operand.vmem [shape: f32[64,256], index: 2, kind: input, shape index: {}]   ;;  %s3828_s1 = inlined_call_operand.vmem [shape: f32[4,128], index: 1, kind: input, shape index: {}]   ;;  %s3829_s0 = inlined_call_operand.vmem [shape: f32[1,128,4], index: 0, kind: input, shape index: {}]   ;;  %s3830_s3 = inlined_call_operand.vmem [shape: f32[1,256], index: 3, kind: input, shape index: {}]   ;;  %s3831_s4 = inlined_call_operand.vmem [shape: f32[32,128], index: 4, kind: input, shape index: {}]   ;;  %s3832_s5 = inlined_call_operand.vmem [shape: f32[1,128], index: 5, kind: input, shape index: {}]   ;;  %s3833_s6 = inlined_call_operand.vmem [shape: f32[1,8,128], index: 6, kind: output, shape index: {}]  }
   0x1   :  { %v255_v0 = vld [vmem:[%s3827_s2 + $0x8] sm:$0xff]  ;;  %v257_v1 = vld [vmem:[%s3827_s2 + $0x18] sm:$0xff]  ;;  %v254_v2 = vld [vmem:[%s3827_s2] sm:$0xff]  ;;  %350 = vmatprep.mubr.f32.mxu1 %v3236_v3  ;;  %vm386_vm2 = vcmask 261120   ;;  %vm282_vm3 = vcmask 523264   ;;  %vm3240_vm4 = vmmov 0  }
   0x2   :  { %v3286_v4 = vpack.c.bf16 %v257_v1, %v255_v0  ;;  %v256_v5 = vld [vmem:[%s3827_s2 + $0x10] sm:$0xff]  ;;  %v259_v6 = vld [vmem:[%s3827_s2 + $0x28] sm:$0xff]  ;;  %v261_v7 = vld [vmem:[%s3827_s2 + $0x38] sm:$0xff]  ;;  %v273_v30 = vshrl.u32 %v272_v28, 7 }
   0x3   :  { %v3297_v8 = vpack.c.bf16 %v256_v5, %v254_v2  ;;  %v3299_v9 = vpack.c.bf16 %v261_v7, %v259_v6  ;;  %v258_v10 = vld [vmem:[%s3827_s2 + $0x20] sm:$0xff]  ;;  %v260_v11 = vld [vmem:[%s3827_s2 + $0x30] sm:$0xff]  ;;  %v263_v12 = vld [vmem:[%s3827_s2 + $0x48] sm:$0xff] }
   0x4   :  { %2698 = vmatprep.subr.bf16.mxu1 %v3286_v4  ;;  %v265_v13 = vld [vmem:[%s3827_s2 + $0x58] sm:$0xff]  ;;  %v3315_v14 = vpack.c.bf16 %v260_v11, %v258_v10  ;;  %v262_v15 = vld [vmem:[%s3827_s2 + $0x40] sm:$0xff]  ;;  %v264_v17 = vld [vmem:[%s3827_s2 + $0x50] sm:$0xff]  ;;  %v274_v32 = vsub.s32 0, %v273_v30  ;;  %v278_v54 = vsub.s32 1, %v273_v30 }
   0x5   :  { %2700 = vmatpush1.bf16.msra.mxu1 %v3297_v8  ;;  %v3321_v16 = vpack.c.bf16 %v265_v13, %v263_v12  ;;  %v39_v18 = vld [vmem:[%s3828_s1] sm:$0xf]  ;;  %v267_v20 = vld [vmem:[%s3827_s2 + $0x68] sm:$0xff]  ;;  %v269_v21 = vld [vmem:[%s3827_s2 + $0x78] sm:$0xff]  ;;  %v3343_v23 = vpack.c.bf16 %v264_v17, %v262_v15 }
   0x6   :  { %2702 = vmatprep.subr.bf16.mxu1 %v3299_v9  ;;  %v23_v19 = vld [vmem:[%s3829_s0] sm:$0xff]  ;;  %2660 = vmatprep.subr.msk.mxu0 %vm89_vm0, %v39_v18  ;;  %v24_v22 = vld [vmem:[%s3829_s0 + $0x8] sm:$0xff]  ;;  %v3347_v24 = vpack.c.bf16 %v269_v21, %v267_v20  ;;  %v268_v26 = vld [vmem:[%s3827_s2 + $0x70] sm:$0xff] }
   0x7   :  { %2662 = vmatprep.mubr.msk.f32.mxu0 %vm40_vm1, %v23_v19  ;;  %2661 = vmatpush3.msk.msra.mxu0 %vm89_vm0, %v39_v18  ;;  %v266_v25 = vld [vmem:[%s3827_s2 + $0x60] sm:$0xff]  ;;  %v29_v30 = vld [vmem:[%s3829_s0 + $0x30] sm:$0xff] }
   0x8   :  { %2663 = vmatmul.mubr.msk.f32.vlgmr.msra.gmra.mrb[0].mxu0 %vm40_vm1, %v24_v22  ;;  %2730 = vmatprep.subr.bf16.mxu0 %v3286_v4  ;;  %v3359_v27 = vpack.c.bf16 %v268_v26, %v266_v25  ;;  %v270_v33 = vld [vmem:[%s3830_s3] sm:$0x3]  ;;  %s3238_s3 = smov 32   ;;  %v25_v25 = vld [vmem:[%s3829_s0 + $0x10] sm:$0xff]  ;;  %v26_v26 = vld [vmem:[%s3829_s0 + $0x18] sm:$0xff] }
   0x9   :  { %2704 = vmatpush1.bf16.msra.mxu1 %v3315_v14  ;;  %2732 = vmatpush1.bf16.msra.mxu0 %v3297_v8  ;;  %v3383_v34 = vrot.slane %v270_v33, %v274_v32  ;;  %v3401_v55 = vrot.slane %v270_v33, %v278_v54  ;;  %v27_v28 = vld [vmem:[%s3829_s0 + $0x20] sm:$0xff] }
   0xa   :  { %2706 = vmatprep.subr.bf16.mxu1 %v3321_v16  ;;  %2734 = vmatprep.subr.bf16.mxu0 %v3299_v9  ;;  %v31_v32 = vld [vmem:[%s3829_s0 + $0x40] sm:$0xff] }
   0xb   :  { %2665 = vmatprep.mubr.msk.f32.mxu0 %vm40_vm1, %v25_v25 }
   0xc   :  { %2666 = vmatmul.mubr.msk.f32.gmra.mrb[2].mxu0 %vm40_vm1, %v26_v26 }
   0xd   :  { %2708 = vmatpush1.bf16.msra.mxu1 %v3343_v23  ;;  %2736 = vmatpush1.bf16.msra.mxu0 %v3315_v14 }
   0xe   :  { %2710 = vmatprep.subr.bf16.mxu1 %v3347_v24  ;;  %2738 = vmatprep.subr.bf16.mxu0 %v3321_v16 }
   0xf   :  { %2668 = vmatprep.mubr.msk.f32.mxu0 %vm40_vm1, %v27_v28 }
  0x11   :  { %2712 = vmatpush1.bf16.msra.mxu1 %v3359_v27  ;;  %2740 = vmatpush1.bf16.msra.mxu0 %v3343_v23 }
  0x12   :  { %2714 = vmatprep.subr.bf16.mxu1 %v3286_v4  ;;  %2742 = vmatprep.subr.bf16.mxu0 %v3347_v24 }
  0x14   :  { %351 = vmatmul.mubr.f32.vlgmr.msra.gmra.mrb[0].mxu1 %v3236_v3 }
  0x15   :  { %2716 = vmatpush1.bf16.msra.mxu1 %v3297_v8  ;;  %455 = vmatprep.mubr.f32.mxu1 %v3236_v3 }
  0x16   :  { %2718 = vmatprep.subr.bf16.mxu1 %v3299_v9  ;;  %2744 = vmatpush1.bf16.msra.mxu0 %v3359_v27 }
  0x17   :  { %2762 = vmatprep.subr.bf16.mxu0 %v3286_v4 }
  0x19   :  { %2720 = vmatpush1.bf16.msra.mxu1 %v3315_v14 }
  0x1a   :  { %2722 = vmatprep.subr.bf16.mxu1 %v3321_v16 }
  0x1d   :  { %2724 = vmatpush1.bf16.msra.mxu1 %v3343_v23 }
  0x1e   :  { %2726 = vmatprep.subr.bf16.mxu1 %v3347_v24 }
  0x21   :  { %2728 = vmatpush1.bf16.msra.mxu1 %v3359_v27 }
  0x22   :  { %2746 = vmatprep.subr.bf16.mxu1 %v3286_v4 }
  0xdb   :  { %v2664_v29 = vpop.f32.mrb[0].mxu0 }
  0xdc   :  { %v159_v31 = vpop.f32.mrb[1].mxu0 }
  0xe7   :  { %v352_v35 = vpop.f32.mrb[0].mxu1 }
  0xe8   :  { %v353_v36 = vadd.f32 %v352_v35, %v3383_v34  ;;  %v354_v37 = vpop.f32.mrb[1].mxu1 }
  0xe9   :  { %v33_v37 = vld [vmem:[%s3829_s0 + $0x50] sm:$0xff] }
  0xea   :  { %v357_v38 = vadd.f32 %v353_v36, %v159_v31  ;;  %v30_v31 = vld [vmem:[%s3829_s0 + $0x38] sm:$0xff]  ;;  %v32_v36 = vld [vmem:[%s3829_s0 + $0x48] sm:$0xff] }
  0xec   :  { %2980 = vtanh.f32 %v357_v38  ;;  %v2588_v40 = vmul.f32 -1.442695, %v357_v38  ;;  %v34_v38 = vld [vmem:[%s3829_s0 + $0x58] sm:$0xff] }
  0xee   :  { %2982 = vpow2.f32 %v2588_v40  ;;  %v36_v40 = vld [vmem:[%s3829_s0 + $0x68] sm:$0xff] }
  0xf6   :  { %v2981_v39 = vpop.eup %2980 }
  0xf7   :  { %367 = vrot.lane.b32.xlu0 %v2981_v39, %s3237_s11  ;;  %v35_v39 = vld [vmem:[%s3829_s0 + $0x60] sm:$0xff] }
  0xf8   :  { %v2983_v41 = vpop.eup %2982 }
  0xf9   :  { %v361_v42 = vadd.f32 1.0, %v2983_v41  ;;  %v37_v41 = vld [vmem:[%s3829_s0 + $0x70] sm:$0xff] }
  0xfb   :  { %2984 = vrcp.f32 %v361_v42  ;;  %v38_v42 = vld [vmem:[%s3829_s0 + $0x78] sm:$0xff] }
 0x105   :  { %v2985_v43 = vpop.eup %2984 }
 0x106   :  { %v365_v46 = vmul.f32 0.0, %v2985_v43 }
 0x169   :  { %v368_v44 = vpop.permute.xlu0 %367 }
 0x16a   :  { %v370_v45 = vmul.f32 %v2985_v43, %v368_v44 }
 0x16c   :  { %372 = vrot.lane.b32.xlu0 %v370_v45, %s3238_s3 }
 0x1de   :  { %v373_v47 = vpop.permute.xlu0 %372 }
 0x1df   :  { %v375_v48 = vadd.f32 %v373_v47, %v365_v46  ;;  %v3476_v47 = vpop.f32.mrb[2].mxu0 }
 0x1e1   :  { %2986 = vtanh.f32 %v375_v48 }
 0x1eb   :  { %v2987_v49 = vpop.eup %2986 }
 0x1ec   :  { %378 = vrot.lane.b32.xlu1 %v2987_v49, %s3237_s11 }
 0x25e   :  { %v379_v50 = vpop.permute.xlu1 %378 }
 0x25f   :  { %v381_v51 = vmul.f32 %v2985_v43, %v379_v50 }
 0x261   :  { %383 = vrot.lane.b32.xlu1 %v381_v51, %s3238_s3 }
 0x2d3   :  { %v384_v52 = vpop.permute.xlu1 %383 }
 0x2d4   :  { %v387_v53 = vsel %vm386_vm2, %v384_v52, 0.0 }
 0x2d5   :  { %2589 = vmatmul.mubr.msk.f32.vlgmr.msra.gmra.mrb[2].mxu1 %vm282_vm3, %v387_v53 }
 0x2d6   :  { %2748 = vmatpush1.bf16.msra.mxu1 %v3297_v8  ;;  %721 = vmatprep.mubr.f32.mxu1 %v3236_v3 }
 0x2d7   :  { %2750 = vmatprep.subr.bf16.mxu1 %v3299_v9 }
 0x2da   :  { %2752 = vmatpush1.bf16.msra.mxu1 %v3315_v14 }
 0x2db   :  { %2754 = vmatprep.subr.bf16.mxu1 %v3321_v16 }
 0x2de   :  { %2756 = vmatpush1.bf16.msra.mxu1 %v3343_v23 }
 0x2df   :  { %2758 = vmatprep.subr.bf16.mxu1 %v3347_v24 }
 0x2e2   :  { %2760 = vmatpush1.bf16.msra.mxu1 %v3359_v27 }
 0x2e3   :  { %2778 = vmatprep.subr.bf16.mxu1 %v3286_v4 }
 0x3a8   :  { %v457_v56 = vpop.f32.mrb[2].mxu1 }
 0x3a9   :  { %v458_v57 = vadd.f32 %v457_v56, %v3383_v34  ;;  %v459_v58 = vpop.f32.mrb[3].mxu1 }
 0x3aa   :  { %v460_v59 = vadd.f32 %v459_v58, %v3401_v55 }
 0x3ab   :  { %v463_v60 = vadd.f32 %v2664_v29, %v458_v57  ;;  %v28_v29 = vld [vmem:[%s3829_s0 + $0x28] sm:$0xff] }
 0x3ac   :  { %2988 = vtanh.f32 %v460_v59  ;;  %v2591_v63 = vmul.f32 -1.442695, %v460_v59  ;;  %2669 = vmatmul.mubr.msk.f32.gmra.mrb[4].mxu0 %vm40_vm1, %v28_v29 }
 0x3ad   :  { %2990 = vtanh.f32 %v463_v60  ;;  %v2590_v0 = vmul.f32 -1.442695, %v463_v60  ;;  %2671 = vmatprep.mubr.msk.f32.mxu0 %vm40_vm1, %v29_v30 }
 0x3ae   :  { %2992 = vpow2.f32 %v2591_v63 }
 0x3af   :  { %2994 = vpow2.f32 %v2590_v0 }
 0x3b0   :  { %2672 = vmatmul.mubr.msk.f32.gmra.mrb[6].mxu0 %vm40_vm1, %v30_v31 }
 0x3b1   :  { %2674 = vmatprep.mubr.msk.f32.mxu0 %vm40_vm1, %v31_v32 }
 0x3b4   :  { %2675 = vmatmul.mubr.msk.f32.gmra.mrb[8].mxu0 %vm40_vm1, %v32_v36 }
 0x3b5   :  { %2677 = vmatprep.mubr.msk.f32.mxu0 %vm40_vm1, %v33_v37 }
 0x3b6   :  { %v2989_v61 = vpop.eup %2988 }
 0x3b7   :  { %v2991_v62 = vpop.eup %2990  ;;  %497 = vrot.lane.b32.xlu1 %v2989_v61, %s3237_s11 }
 0x3b8   :  { %473 = vrot.lane.b32.xlu0 %v2991_v62, %s3237_s11  ;;  %v2993_v1 = vpop.eup %2992  ;;  %2678 = vmatmul.mubr.msk.f32.gmra.mrb[10].mxu0 %vm40_vm1, %v34_v38 }
 0x3b9   :  { %v2995_v2 = vpop.eup %2994  ;;  %v491_v5 = vadd.f32 1.0, %v2993_v1  ;;  %2680 = vmatprep.mubr.msk.f32.mxu0 %vm40_vm1, %v35_v39 }
 0x3ba   :  { %v467_v6 = vadd.f32 1.0, %v2995_v2 }
 0x3bb   :  { %2996 = vrcp.f32 %v491_v5 }
 0x3bc   :  { %2998 = vrcp.f32 %v467_v6  ;;  %2681 = vmatmul.mubr.msk.f32.gmra.mrb[12].mxu0 %vm40_vm1, %v36_v40 }
 0x3bd   :  { %2683 = vmatprep.mubr.msk.f32.mxu0 %vm40_vm1, %v37_v41 }
 0x3c0   :  { %2684 = vmatmul.mubr.msk.f32.gmra.mrb[14].mxu0 %vm40_vm1, %v38_v42 }
 0x3c1   :  { %588 = vmatprep.mubr.f32.mxu0 %v3236_v3 }
 0x3c5   :  { %v2997_v7 = vpop.eup %2996 }
 0x3c6   :  { %v2999_v11 = vpop.eup %2998  ;;  %v495_v17 = vmul.f32 0.0, %v2997_v7 }
 0x3c7   :  { %v471_v19 = vmul.f32 %v2999_v11, %v375_v48  ;;  %v169_v48 = vpop.f32.mrb[3].mxu0 }
 0x429   :  { %v498_v10 = vpop.permute.xlu1 %497 }
 0x42a   :  { %v500_v12 = vmul.f32 %v2997_v7, %v498_v10  ;;  %v474_v13 = vpop.permute.xlu0 %473 }
 0x42b   :  { %v476_v15 = vmul.f32 %v2999_v11, %v474_v13 }
 0x42c   :  { %502 = vrot.lane.b32.xlu1 %v500_v12, %s3238_s3 }
 0x42d   :  { %478 = vrot.lane.b32.xlu0 %v476_v15, %s3238_s3 }
 0x47f   :  { %v3478_v49 = vpop.f32.mrb[4].mxu0 }
 0x480   :  { %v3480_v50 = vpop.f32.mrb[5].mxu0 }
 0x483   :  { %v3482_v51 = vpop.f32.mrb[6].mxu0 }
 0x484   :  { %v3484_v52 = vpop.f32.mrb[7].mxu0 }
 0x487   :  { %v3486_v53 = vpop.f32.mrb[8].mxu0 }
 0x488   :  { %v3488_v54 = vpop.f32.mrb[9].mxu0 }
 0x48b   :  { %v3490_v56 = vpop.f32.mrb[10].mxu0 }
 0x48c   :  { %v3492_v57 = vpop.f32.mrb[11].mxu0 }
 0x48f   :  { %v3494_v58 = vpop.f32.mrb[12].mxu0 }
 0x490   :  { %v3496_v59 = vpop.f32.mrb[13].mxu0 }
 0x493   :  { %v3498_v60 = vpop.f32.mrb[14].mxu0 }
 0x494   :  { %v3500_v61 = vpop.f32.mrb[15].mxu0 }
 0x49e   :  { %v503_v18 = vpop.permute.xlu1 %502 }
 0x49f   :  { %v3409_v20 = vadd.f32 %v503_v18, %v495_v17  ;;  %v479_v21 = vpop.permute.xlu0 %478 }
 0x4a0   :  { %v3411_v22 = vadd.f32 %v479_v21, %v471_v19 }
 0x4a1   :  { %3000 = vtanh.f32 %v3409_v20 }
 0x4a2   :  { %3002 = vtanh.f32 %v3411_v22 }
 0x4ab   :  { %v3001_v33 = vpop.eup %3000 }
 0x4ac   :  { %v3003_v35 = vpop.eup %3002  ;;  %508 = vrot.lane.b32.xlu1 %v3001_v33, %s3237_s11 }
 0x4ad   :  { %484 = vrot.lane.b32.xlu0 %v3003_v35, %s3237_s11 }
 0x51e   :  { %v509_v43 = vpop.permute.xlu1 %508 }
 0x51f   :  { %v511_v44 = vmul.f32 %v2997_v7, %v509_v43  ;;  %v485_v45 = vpop.permute.xlu0 %484 }
 0x520   :  { %v487_v46 = vmul.f32 %v2999_v11, %v485_v45 }
 0x521   :  { %517 = vrot.lane.b32.xlu1 %v511_v44, %s3237_s11 }
 0x522   :  { %513 = vrot.lane.b32.xlu0 %v487_v46, %s3238_s3 }
 0x593   :  { %v518_v62 = vpop.permute.xlu1 %517 }
 0x594   :  { %v514_v63 = vpop.permute.xlu0 %513 }
 0x595   :  { %v520_v0 = vsel %vm386_vm2, %v514_v63, %v518_v62 }
 0x596   :  { %2592 = vmatmul.mubr.msk.f32.vlgmr.msra.gmra.mrb[16].mxu0 %vm282_vm3, %v520_v0 }
 0x597   :  { %2764 = vmatpush1.bf16.msra.mxu0 %v3297_v8  ;;  %854 = vmatprep.mubr.f32.mxu0 %v3236_v3 }
 0x598   :  { %2766 = vmatprep.subr.bf16.mxu0 %v3299_v9 }
 0x59b   :  { %2768 = vmatpush1.bf16.msra.mxu0 %v3315_v14 }
 0x59c   :  { %2770 = vmatprep.subr.bf16.mxu0 %v3321_v16 }
 0x59f   :  { %2772 = vmatpush1.bf16.msra.mxu0 %v3343_v23 }
 0x5a0   :  { %2774 = vmatprep.subr.bf16.mxu0 %v3347_v24 }
 0x5a3   :  { %2776 = vmatpush1.bf16.msra.mxu0 %v3359_v27 }
 0x5a4   :  { %2794 = vmatprep.subr.bf16.mxu0 %v3286_v4 }
 0x669   :  { %v590_v1 = vpop.f32.mrb[16].mxu0 }
 0x66a   :  { %v591_v2 = vadd.f32 %v590_v1, %v3383_v34  ;;  %v592_v5 = vpop.f32.mrb[17].mxu0 }
 0x66b   :  { %v593_v6 = vadd.f32 %v592_v5, %v3401_v55 }
 0x66c   :  { %v596_v7 = vadd.f32 %v591_v2, %v169_v48 }
 0x66d   :  { %3004 = vtanh.f32 %v593_v6  ;;  %v2594_v12 = vmul.f32 -1.442695, %v593_v6 }
 0x66e   :  { %3006 = vtanh.f32 %v596_v7  ;;  %v2593_v13 = vmul.f32 -1.442695, %v596_v7 }
 0x66f   :  { %3008 = vpow2.f32 %v2594_v12 }
 0x670   :  { %3010 = vpow2.f32 %v2593_v13 }
 0x677   :  { %v3005_v10 = vpop.eup %3004 }
 0x678   :  { %v3007_v11 = vpop.eup %3006  ;;  %630 = vrot.lane.b32.xlu1 %v3005_v10, %s3237_s11 }
 0x679   :  { %606 = vrot.lane.b32.xlu0 %v3007_v11, %s3237_s11  ;;  %v3009_v15 = vpop.eup %3008 }
 0x67a   :  { %v3011_v17 = vpop.eup %3010  ;;  %v624_v18 = vadd.f32 1.0, %v3009_v15 }
 0x67b   :  { %v600_v19 = vadd.f32 1.0, %v3011_v17 }
 0x67c   :  { %3012 = vrcp.f32 %v624_v18 }
 0x67d   :  { %3014 = vrcp.f32 %v600_v19 }
 0x686   :  { %v3013_v21 = vpop.eup %3012 }
 0x687   :  { %v3015_v26 = vpop.eup %3014  ;;  %v628_v31 = vmul.f32 %v3013_v21, %v3409_v20 }
 0x688   :  { %v604_v33 = vmul.f32 %v3015_v26, %v3411_v22 }
 0x6ea   :  { %v631_v25 = vpop.permute.xlu1 %630 }
 0x6eb   :  { %v633_v28 = vmul.f32 %v3013_v21, %v631_v25  ;;  %v607_v29 = vpop.permute.xlu0 %606 }
 0x6ec   :  { %v609_v30 = vmul.f32 %v3015_v26, %v607_v29 }
 0x6ed   :  { %635 = vrot.lane.b32.xlu1 %v633_v28, %s3238_s3 }
 0x6ee   :  { %611 = vrot.lane.b32.xlu0 %v609_v30, %s3238_s3 }
 0x75f   :  { %v636_v32 = vpop.permute.xlu1 %635 }
 0x760   :  { %v638_v35 = vadd.f32 %v636_v32, %v628_v31  ;;  %v612_v36 = vpop.permute.xlu0 %611 }
 0x761   :  { %v614_v37 = vadd.f32 %v612_v36, %v604_v33 }
 0x762   :  { %3016 = vtanh.f32 %v638_v35 }
 0x763   :  { %3018 = vtanh.f32 %v614_v37 }
 0x76c   :  { %v3017_v38 = vpop.eup %3016 }
 0x76d   :  { %v3019_v39 = vpop.eup %3018  ;;  %641 = vrot.lane.b32.xlu1 %v3017_v38, %s3237_s11 }
 0x76e   :  { %617 = vrot.lane.b32.xlu0 %v3019_v39, %s3237_s11 }
 0x7df   :  { %v642_v40 = vpop.permute.xlu1 %641 }
 0x7e0   :  { %v644_v41 = vmul.f32 %v3013_v21, %v642_v40  ;;  %v618_v42 = vpop.permute.xlu0 %617 }
 0x7e1   :  { %v620_v43 = vmul.f32 %v3015_v26, %v618_v42 }
 0x7e2   :  { %650 = vrot.lane.b32.xlu1 %v644_v41, %s3237_s11 }
 0x7e3   :  { %646 = vrot.lane.b32.xlu0 %v620_v43, %s3238_s3 }
 0x854   :  { %v651_v20 = vpop.permute.xlu1 %650 }
 0x855   :  { %v647_v22 = vpop.permute.xlu0 %646 }
 0x856   :  { %v653_v44 = vsel %vm386_vm2, %v647_v22, %v651_v20 }
 0x857   :  { %2595 = vmatmul.mubr.msk.f32.vlgmr.msra.gmra.mrb[4].mxu1 %vm282_vm3, %v653_v44 }
 0x858   :  { %2780 = vmatpush1.bf16.msra.mxu1 %v3297_v8  ;;  %987 = vmatprep.mubr.f32.mxu1 %v3236_v3 }
 0x859   :  { %2782 = vmatprep.subr.bf16.mxu1 %v3299_v9 }
 0x85c   :  { %2784 = vmatpush1.bf16.msra.mxu1 %v3315_v14 }
 0x85d   :  { %2786 = vmatprep.subr.bf16.mxu1 %v3321_v16 }
 0x860   :  { %2788 = vmatpush1.bf16.msra.mxu1 %v3343_v23 }
 0x861   :  { %2790 = vmatprep.subr.bf16.mxu1 %v3347_v24 }
 0x864   :  { %2792 = vmatpush1.bf16.msra.mxu1 %v3359_v27 }
 0x865   :  { %2810 = vmatprep.subr.bf16.mxu1 %v3286_v4 }
 0x92a   :  { %v723_v45 = vpop.f32.mrb[4].mxu1 }
 0x92b   :  { %v724_v46 = vadd.f32 %v723_v45, %v3383_v34  ;;  %v725_v48 = vpop.f32.mrb[5].mxu1 }
 0x92c   :  { %v726_v62 = vadd.f32 %v725_v48, %v3401_v55 }
 0x92d   :  { %v729_v63 = vadd.f32 %v3476_v47, %v724_v46 }
 0x92e   :  { %3020 = vtanh.f32 %v726_v62  ;;  %v2597_v2 = vmul.f32 -1.442695, %v726_v62 }
 0x92f   :  { %3022 = vtanh.f32 %v729_v63  ;;  %v2596_v5 = vmul.f32 -1.442695, %v729_v63 }
 0x930   :  { %3024 = vpow2.f32 %v2597_v2 }
 0x931   :  { %3026 = vpow2.f32 %v2596_v5 }
 0x938   :  { %v3021_v0 = vpop.eup %3020 }
 0x939   :  { %v3023_v1 = vpop.eup %3022  ;;  %763 = vrot.lane.b32.xlu1 %v3021_v0, %s3237_s11 }
 0x93a   :  { %739 = vrot.lane.b32.xlu0 %v3023_v1, %s3237_s11  ;;  %v3025_v6 = vpop.eup %3024 }
 0x93b   :  { %v3027_v7 = vpop.eup %3026  ;;  %v757_v10 = vadd.f32 1.0, %v3025_v6 }
 0x93c   :  { %v733_v11 = vadd.f32 1.0, %v3027_v7 }
 0x93d   :  { %3028 = vrcp.f32 %v757_v10 }
 0x93e   :  { %3030 = vrcp.f32 %v733_v11 }
 0x947   :  { %v3029_v12 = vpop.eup %3028 }
 0x948   :  { %v3031_v13 = vpop.eup %3030  ;;  %v761_v19 = vmul.f32 %v3029_v12, %v638_v35 }
 0x949   :  { %v737_v25 = vmul.f32 %v3031_v13, %v614_v37 }
 0x9ab   :  { %v764_v47 = vpop.permute.xlu1 %763 }
 0x9ac   :  { %v766_v15 = vmul.f32 %v3029_v12, %v764_v47  ;;  %v740_v17 = vpop.permute.xlu0 %739 }
 0x9ad   :  { %v742_v18 = vmul.f32 %v3031_v13, %v740_v17 }
 0x9ae   :  { %768 = vrot.lane.b32.xlu1 %v766_v15, %s3238_s3 }
 0x9af   :  { %744 = vrot.lane.b32.xlu0 %v742_v18, %s3238_s3 }
 0xa20   :  { %v769_v21 = vpop.permute.xlu1 %768 }
 0xa21   :  { %v771_v26 = vadd.f32 %v769_v21, %v761_v19  ;;  %v745_v28 = vpop.permute.xlu0 %744 }
 0xa22   :  { %v747_v29 = vadd.f32 %v745_v28, %v737_v25 }
 0xa23   :  { %3032 = vtanh.f32 %v771_v26 }
 0xa24   :  { %3034 = vtanh.f32 %v747_v29 }
 0xa2d   :  { %v3033_v30 = vpop.eup %3032 }
 0xa2e   :  { %v3035_v31 = vpop.eup %3034  ;;  %774 = vrot.lane.b32.xlu1 %v3033_v30, %s3237_s11 }
 0xa2f   :  { %750 = vrot.lane.b32.xlu0 %v3035_v31, %s3237_s11 }
 0xaa0   :  { %v775_v32 = vpop.permute.xlu1 %774 }
 0xaa1   :  { %v777_v33 = vmul.f32 %v3029_v12, %v775_v32  ;;  %v751_v36 = vpop.permute.xlu0 %750 }
 0xaa2   :  { %v753_v38 = vmul.f32 %v3031_v13, %v751_v36 }
 0xaa3   :  { %783 = vrot.lane.b32.xlu1 %v777_v33, %s3237_s11 }
 0xaa4   :  { %779 = vrot.lane.b32.xlu0 %v753_v38, %s3238_s3 }
 0xb15   :  { %v784_v35 = vpop.permute.xlu1 %783 }
 0xb16   :  { %v780_v37 = vpop.permute.xlu0 %779 }
 0xb17   :  { %v786_v39 = vsel %vm386_vm2, %v780_v37, %v784_v35 }
 0xb18   :  { %2598 = vmatmul.mubr.msk.f32.vlgmr.msra.gmra.mrb[18].mxu0 %vm282_vm3, %v786_v39 }
 0xb19   :  { %2796 = vmatpush1.bf16.msra.mxu0 %v3297_v8  ;;  %1120 = vmatprep.mubr.f32.mxu0 %v3236_v3 }
 0xb1a   :  { %2798 = vmatprep.subr.bf16.mxu0 %v3299_v9 }
 0xb1d   :  { %2800 = vmatpush1.bf16.msra.mxu0 %v3315_v14 }
 0xb1e   :  { %2802 = vmatprep.subr.bf16.mxu0 %v3321_v16 }
 0xb21   :  { %2804 = vmatpush1.bf16.msra.mxu0 %v3343_v23 }
 0xb22   :  { %2806 = vmatprep.subr.bf16.mxu0 %v3347_v24 }
 0xb25   :  { %2808 = vmatpush1.bf16.msra.mxu0 %v3359_v27 }
 0xb26   :  { %2826 = vmatprep.subr.bf16.mxu0 %v3286_v4 }
 0xbeb   :  { %v856_v40 = vpop.f32.mrb[18].mxu0 }
 0xbec   :  { %v857_v41 = vadd.f32 %v856_v40, %v3383_v34  ;;  %v858_v42 = vpop.f32.mrb[19].mxu0 }
 0xbed   :  { %v859_v43 = vadd.f32 %v858_v42, %v3401_v55 }
 0xbee   :  { %v862_v20 = vadd.f32 %v857_v41, %v3480_v50 }
 0xbef   :  { %3036 = vtanh.f32 %v859_v43  ;;  %v2600_v45 = vmul.f32 -1.442695, %v859_v43 }
 0xbf0   :  { %3038 = vtanh.f32 %v862_v20  ;;  %v2599_v46 = vmul.f32 -1.442695, %v862_v20 }
 0xbf1   :  { %3040 = vpow2.f32 %v2600_v45 }
 0xbf2   :  { %3042 = vpow2.f32 %v2599_v46 }
 0xbf9   :  { %v3037_v22 = vpop.eup %3036 }
 0xbfa   :  { %v3039_v44 = vpop.eup %3038  ;;  %896 = vrot.lane.b32.xlu1 %v3037_v22, %s3237_s11 }
 0xbfb   :  { %872 = vrot.lane.b32.xlu0 %v3039_v44, %s3237_s11  ;;  %v3041_v48 = vpop.eup %3040 }
 0xbfc   :  { %v3043_v62 = vpop.eup %3042  ;;  %v890_v63 = vadd.f32 1.0, %v3041_v48 }
 0xbfd   :  { %v866_v0 = vadd.f32 1.0, %v3043_v62 }
 0xbfe   :  { %3044 = vrcp.f32 %v890_v63 }
 0xbff   :  { %3046 = vrcp.f32 %v866_v0 }
 0xc08   :  { %v3045_v1 = vpop.eup %3044 }
 0xc09   :  { %v3047_v2 = vpop.eup %3046  ;;  %v894_v10 = vmul.f32 %v3045_v1, %v771_v26 }
 0xc0a   :  { %v870_v12 = vmul.f32 %v3047_v2, %v747_v29 }
 0xc6c   :  { %v897_v50 = vpop.permute.xlu1 %896 }
 0xc6d   :  { %v899_v5 = vmul.f32 %v3045_v1, %v897_v50  ;;  %v873_v6 = vpop.permute.xlu0 %872 }
 0xc6e   :  { %v875_v7 = vmul.f32 %v3047_v2, %v873_v6 }
 0xc6f   :  { %901 = vrot.lane.b32.xlu1 %v899_v5, %s3238_s3 }
 0xc70   :  { %877 = vrot.lane.b32.xlu0 %v875_v7, %s3238_s3 }
 0xce1   :  { %v902_v11 = vpop.permute.xlu1 %901 }
 0xce2   :  { %v904_v47 = vadd.f32 %v902_v11, %v894_v10  ;;  %v878_v13 = vpop.permute.xlu0 %877 }
 0xce3   :  { %v880_v15 = vadd.f32 %v878_v13, %v870_v12 }
 0xce4   :  { %3048 = vtanh.f32 %v904_v47 }
 0xce5   :  { %3050 = vtanh.f32 %v880_v15 }
 0xcee   :  { %v3049_v17 = vpop.eup %3048 }
 0xcef   :  { %v3051_v18 = vpop.eup %3050  ;;  %907 = vrot.lane.b32.xlu1 %v3049_v17, %s3237_s11 }
 0xcf0   :  { %883 = vrot.lane.b32.xlu0 %v3051_v18, %s3237_s11 }
 0xd61   :  { %v908_v19 = vpop.permute.xlu1 %907 }
 0xd62   :  { %v910_v21 = vmul.f32 %v3045_v1, %v908_v19  ;;  %v884_v25 = vpop.permute.xlu0 %883 }
 0xd63   :  { %v886_v28 = vmul.f32 %v3047_v2, %v884_v25 }
 0xd64   :  { %916 = vrot.lane.b32.xlu1 %v910_v21, %s3237_s11 }
 0xd65   :  { %912 = vrot.lane.b32.xlu0 %v886_v28, %s3238_s3 }
 0xdd6   :  { %v917_v26 = vpop.permute.xlu1 %916 }
 0xdd7   :  { %v913_v29 = vpop.permute.xlu0 %912 }
 0xdd8   :  { %v919_v30 = vsel %vm386_vm2, %v913_v29, %v917_v26 }
 0xdd9   :  { %2601 = vmatmul.mubr.msk.f32.vlgmr.msra.gmra.mrb[6].mxu1 %vm282_vm3, %v919_v30 }
 0xdda   :  { %2812 = vmatpush1.bf16.msra.mxu1 %v3297_v8  ;;  %1253 = vmatprep.mubr.f32.mxu1 %v3236_v3 }
 0xddb   :  { %2814 = vmatprep.subr.bf16.mxu1 %v3299_v9 }
 0xdde   :  { %2816 = vmatpush1.bf16.msra.mxu1 %v3315_v14 }
 0xddf   :  { %2818 = vmatprep.subr.bf16.mxu1 %v3321_v16 }
 0xde2   :  { %2820 = vmatpush1.bf16.msra.mxu1 %v3343_v23 }
 0xde3   :  { %2822 = vmatprep.subr.bf16.mxu1 %v3347_v24 }
 0xde6   :  { %2824 = vmatpush1.bf16.msra.mxu1 %v3359_v27 }
 0xde7   :  { %2842 = vmatprep.subr.bf16.mxu1 %v3286_v4 }
 0xeac   :  { %v989_v31 = vpop.f32.mrb[6].mxu1 }
 0xead   :  { %v990_v32 = vadd.f32 %v989_v31, %v3383_v34  ;;  %v991_v33 = vpop.f32.mrb[7].mxu1 }
 0xeae   :  { %v992_v36 = vadd.f32 %v991_v33, %v3401_v55 }
 0xeaf   :  { %v995_v38 = vadd.f32 %v3478_v49, %v990_v32 }
 0xeb0   :  { %3052 = vtanh.f32 %v992_v36  ;;  %v2603_v39 = vmul.f32 -1.442695, %v992_v36 }
 0xeb1   :  { %3054 = vtanh.f32 %v995_v38  ;;  %v2602_v40 = vmul.f32 -1.442695, %v995_v38 }
 0xeb2   :  { %3056 = vpow2.f32 %v2603_v39 }
 0xeb3   :  { %3058 = vpow2.f32 %v2602_v40 }
 0xeba   :  { %v3053_v35 = vpop.eup %3052 }
 0xebb   :  { %v3055_v37 = vpop.eup %3054  ;;  %1029 = vrot.lane.b32.xlu1 %v3053_v35, %s3237_s11 }
 0xebc   :  { %1005 = vrot.lane.b32.xlu0 %v3055_v37, %s3237_s11  ;;  %v3057_v41 = vpop.eup %3056 }
 0xebd   :  { %v3059_v42 = vpop.eup %3058  ;;  %v1023_v43 = vadd.f32 1.0, %v3057_v41 }
 0xebe   :  { %v999_v20 = vadd.f32 1.0, %v3059_v42 }
 0xebf   :  { %3060 = vrcp.f32 %v1023_v43 }
 0xec0   :  { %3062 = vrcp.f32 %v999_v20 }
 0xec9   :  { %v3061_v22 = vpop.eup %3060 }
 0xeca   :  { %v3063_v44 = vpop.eup %3062  ;;  %v1027_v62 = vmul.f32 %v3061_v22, %v904_v47 }
 0xecb   :  { %v1003_v0 = vmul.f32 %v3063_v44, %v880_v15 }
 0xf2d   :  { %v1030_v49 = vpop.permute.xlu1 %1029 }
 0xf2e   :  { %v1032_v45 = vmul.f32 %v3061_v22, %v1030_v49  ;;  %v1006_v46 = vpop.permute.xlu0 %1005 }
 0xf2f   :  { %v1008_v48 = vmul.f32 %v3063_v44, %v1006_v46 }
 0xf30   :  { %1034 = vrot.lane.b32.xlu1 %v1032_v45, %s3238_s3 }
 0xf31   :  { %1010 = vrot.lane.b32.xlu0 %v1008_v48, %s3238_s3 }
 0xfa2   :  { %v1035_v63 = vpop.permute.xlu1 %1034 }
 0xfa3   :  { %v1037_v1 = vadd.f32 %v1035_v63, %v1027_v62  ;;  %v1011_v50 = vpop.permute.xlu0 %1010 }
 0xfa4   :  { %v1013_v2 = vadd.f32 %v1011_v50, %v1003_v0 }
 0xfa5   :  { %3064 = vtanh.f32 %v1037_v1 }
 0xfa6   :  { %3066 = vtanh.f32 %v1013_v2 }
 0xfaf   :  { %v3065_v5 = vpop.eup %3064 }
 0xfb0   :  { %v3067_v6 = vpop.eup %3066  ;;  %1040 = vrot.lane.b32.xlu1 %v3065_v5, %s3237_s11 }
 0xfb1   :  { %1016 = vrot.lane.b32.xlu0 %v3067_v6, %s3237_s11 }
0x1022   :  { %v1041_v7 = vpop.permute.xlu1 %1040 }
0x1023   :  { %v1043_v10 = vmul.f32 %v3061_v22, %v1041_v7  ;;  %v1017_v11 = vpop.permute.xlu0 %1016 }
0x1024   :  { %v1019_v12 = vmul.f32 %v3063_v44, %v1017_v11 }
0x1025   :  { %1049 = vrot.lane.b32.xlu1 %v1043_v10, %s3237_s11 }
0x1026   :  { %1045 = vrot.lane.b32.xlu0 %v1019_v12, %s3238_s3 }
0x1097   :  { %v1050_v47 = vpop.permute.xlu1 %1049 }
0x1098   :  { %v1046_v13 = vpop.permute.xlu0 %1045 }
0x1099   :  { %v1052_v15 = vsel %vm386_vm2, %v1046_v13, %v1050_v47 }
0x109a   :  { %2604 = vmatmul.mubr.msk.f32.vlgmr.msra.gmra.mrb[20].mxu0 %vm282_vm3, %v1052_v15 }
0x109b   :  { %2828 = vmatpush1.bf16.msra.mxu0 %v3297_v8  ;;  %1386 = vmatprep.mubr.f32.mxu0 %v3236_v3 }
0x109c   :  { %2830 = vmatprep.subr.bf16.mxu0 %v3299_v9 }
0x109f   :  { %2832 = vmatpush1.bf16.msra.mxu0 %v3315_v14 }
0x10a0   :  { %2834 = vmatprep.subr.bf16.mxu0 %v3321_v16 }
0x10a3   :  { %2836 = vmatpush1.bf16.msra.mxu0 %v3343_v23 }
0x10a4   :  { %2838 = vmatprep.subr.bf16.mxu0 %v3347_v24 }
0x10a7   :  { %2840 = vmatpush1.bf16.msra.mxu0 %v3359_v27 }
0x10a8   :  { %2858 = vmatprep.subr.bf16.mxu0 %v3286_v4 }
0x116d   :  { %v1122_v17 = vpop.f32.mrb[20].mxu0 }
0x116e   :  { %v1123_v18 = vadd.f32 %v1122_v17, %v3383_v34  ;;  %v1124_v19 = vpop.f32.mrb[21].mxu0 }
0x116f   :  { %v1125_v21 = vadd.f32 %v1124_v19, %v3401_v55 }
0x1170   :  { %v1128_v25 = vadd.f32 %v1123_v18, %v3484_v52 }
0x1171   :  { %3068 = vtanh.f32 %v1125_v21  ;;  %v2606_v29 = vmul.f32 -1.442695, %v1125_v21 }
0x1172   :  { %3070 = vtanh.f32 %v1128_v25  ;;  %v2605_v30 = vmul.f32 -1.442695, %v1128_v25 }
0x1173   :  { %3072 = vpow2.f32 %v2606_v29 }
0x1174   :  { %3074 = vpow2.f32 %v2605_v30 }
0x117b   :  { %v3069_v28 = vpop.eup %3068 }
0x117c   :  { %v3071_v26 = vpop.eup %3070  ;;  %1162 = vrot.lane.b32.xlu1 %v3069_v28, %s3237_s11 }
0x117d   :  { %1138 = vrot.lane.b32.xlu0 %v3071_v26, %s3237_s11  ;;  %v3073_v31 = vpop.eup %3072 }
0x117e   :  { %v3075_v32 = vpop.eup %3074  ;;  %v1156_v33 = vadd.f32 1.0, %v3073_v31 }
0x117f   :  { %v1132_v36 = vadd.f32 1.0, %v3075_v32 }
0x1180   :  { %3076 = vrcp.f32 %v1156_v33 }
0x1181   :  { %3078 = vrcp.f32 %v1132_v36 }
0x118a   :  { %v3077_v38 = vpop.eup %3076 }
0x118b   :  { %v3079_v35 = vpop.eup %3078  ;;  %v1160_v41 = vmul.f32 %v3077_v38, %v1037_v1 }
0x118c   :  { %v1136_v43 = vmul.f32 %v3079_v35, %v1013_v2 }
0x11ee   :  { %v1163_v52 = vpop.permute.xlu1 %1162 }
0x11ef   :  { %v1165_v37 = vmul.f32 %v3077_v38, %v1163_v52  ;;  %v1139_v39 = vpop.permute.xlu0 %1138 }
0x11f0   :  { %v1141_v40 = vmul.f32 %v3079_v35, %v1139_v39 }
0x11f1   :  { %1167 = vrot.lane.b32.xlu1 %v1165_v37, %s3238_s3 }
0x11f2   :  { %1143 = vrot.lane.b32.xlu0 %v1141_v40, %s3238_s3 }
0x1263   :  { %v1168_v42 = vpop.permute.xlu1 %1167 }
0x1264   :  { %v1170_v20 = vadd.f32 %v1168_v42, %v1160_v41  ;;  %v1144_v22 = vpop.permute.xlu0 %1143 }
0x1265   :  { %v1146_v49 = vadd.f32 %v1144_v22, %v1136_v43 }
0x1266   :  { %3080 = vtanh.f32 %v1170_v20 }
0x1267   :  { %3082 = vtanh.f32 %v1146_v49 }
0x1270   :  { %v3081_v44 = vpop.eup %3080 }
0x1271   :  { %v3083_v45 = vpop.eup %3082  ;;  %1173 = vrot.lane.b32.xlu1 %v3081_v44, %s3237_s11 }
0x1272   :  { %1149 = vrot.lane.b32.xlu0 %v3083_v45, %s3237_s11 }
0x12e3   :  { %v1174_v46 = vpop.permute.xlu1 %1173 }
0x12e4   :  { %v1176_v48 = vmul.f32 %v3077_v38, %v1174_v46  ;;  %v1150_v62 = vpop.permute.xlu0 %1149 }
0x12e5   :  { %v1152_v63 = vmul.f32 %v3079_v35, %v1150_v62 }
0x12e6   :  { %1182 = vrot.lane.b32.xlu1 %v1176_v48, %s3237_s11 }
0x12e7   :  { %1178 = vrot.lane.b32.xlu0 %v1152_v63, %s3238_s3 }
0x1358   :  { %v1183_v0 = vpop.permute.xlu1 %1182 }
0x1359   :  { %v1179_v1 = vpop.permute.xlu0 %1178 }
0x135a   :  { %v1185_v50 = vsel %vm386_vm2, %v1179_v1, %v1183_v0 }
0x135b   :  { %2607 = vmatmul.mubr.msk.f32.vlgmr.msra.gmra.mrb[8].mxu1 %vm282_vm3, %v1185_v50 }
0x135c   :  { %2844 = vmatpush1.bf16.msra.mxu1 %v3297_v8  ;;  %1519 = vmatprep.mubr.f32.mxu1 %v3236_v3 }
0x135d   :  { %2846 = vmatprep.subr.bf16.mxu1 %v3299_v9 }
0x1360   :  { %2848 = vmatpush1.bf16.msra.mxu1 %v3315_v14 }
0x1361   :  { %2850 = vmatprep.subr.bf16.mxu1 %v3321_v16 }
0x1364   :  { %2852 = vmatpush1.bf16.msra.mxu1 %v3343_v23 }
0x1365   :  { %2854 = vmatprep.subr.bf16.mxu1 %v3347_v24 }
0x1368   :  { %2856 = vmatpush1.bf16.msra.mxu1 %v3359_v27 }
0x1369   :  { %2874 = vmatprep.subr.bf16.mxu1 %v3286_v4 }
0x142e   :  { %v1255_v2 = vpop.f32.mrb[8].mxu1 }
0x142f   :  { %v1256_v5 = vadd.f32 %v1255_v2, %v3383_v34  ;;  %v1257_v6 = vpop.f32.mrb[9].mxu1 }
0x1430   :  { %v1258_v7 = vadd.f32 %v1257_v6, %v3401_v55 }
0x1431   :  { %v1261_v10 = vadd.f32 %v3482_v51, %v1256_v5 }
0x1432   :  { %3084 = vtanh.f32 %v1258_v7  ;;  %v2609_v47 = vmul.f32 -1.442695, %v1258_v7 }
0x1433   :  { %3086 = vtanh.f32 %v1261_v10  ;;  %v2608_v13 = vmul.f32 -1.442695, %v1261_v10 }
0x1434   :  { %3088 = vpow2.f32 %v2609_v47 }
0x1435   :  { %3090 = vpow2.f32 %v2608_v13 }
0x143c   :  { %v3085_v11 = vpop.eup %3084 }
0x143d   :  { %v3087_v12 = vpop.eup %3086  ;;  %1295 = vrot.lane.b32.xlu1 %v3085_v11, %s3237_s11 }
0x143e   :  { %1271 = vrot.lane.b32.xlu0 %v3087_v12, %s3237_s11  ;;  %v3089_v15 = vpop.eup %3088 }
0x143f   :  { %v3091_v17 = vpop.eup %3090  ;;  %v1289_v18 = vadd.f32 1.0, %v3089_v15 }
0x1440   :  { %v1265_v19 = vadd.f32 1.0, %v3091_v17 }
0x1441   :  { %3092 = vrcp.f32 %v1289_v18 }
0x1442   :  { %3094 = vrcp.f32 %v1265_v19 }
0x144b   :  { %v3093_v21 = vpop.eup %3092 }
0x144c   :  { %v3095_v25 = vpop.eup %3094  ;;  %v1293_v30 = vmul.f32 %v3093_v21, %v1170_v20 }
0x144d   :  { %v1269_v32 = vmul.f32 %v3095_v25, %v1146_v49 }
0x14af   :  { %v1296_v51 = vpop.permute.xlu1 %1295 }
0x14b0   :  { %v1298_v28 = vmul.f32 %v3093_v21, %v1296_v51  ;;  %v1272_v26 = vpop.permute.xlu0 %1271 }
0x14b1   :  { %v1274_v29 = vmul.f32 %v3095_v25, %v1272_v26 }
0x14b2   :  { %1300 = vrot.lane.b32.xlu1 %v1298_v28, %s3238_s3 }
0x14b3   :  { %1276 = vrot.lane.b32.xlu0 %v1274_v29, %s3238_s3 }
0x1524   :  { %v1301_v31 = vpop.permute.xlu1 %1300 }
0x1525   :  { %v1303_v33 = vadd.f32 %v1301_v31, %v1293_v30  ;;  %v1277_v36 = vpop.permute.xlu0 %1276 }
0x1526   :  { %v1279_v38 = vadd.f32 %v1277_v36, %v1269_v32 }
0x1527   :  { %3096 = vtanh.f32 %v1303_v33 }
0x1528   :  { %3098 = vtanh.f32 %v1279_v38 }
0x1531   :  { %v3097_v52 = vpop.eup %3096 }
0x1532   :  { %v3099_v35 = vpop.eup %3098  ;;  %1306 = vrot.lane.b32.xlu1 %v3097_v52, %s3237_s11 }
0x1533   :  { %1282 = vrot.lane.b32.xlu0 %v3099_v35, %s3237_s11 }
0x15a4   :  { %v1307_v37 = vpop.permute.xlu1 %1306 }
0x15a5   :  { %v1309_v39 = vmul.f32 %v3093_v21, %v1307_v37  ;;  %v1283_v40 = vpop.permute.xlu0 %1282 }
0x15a6   :  { %v1285_v41 = vmul.f32 %v3095_v25, %v1283_v40 }
0x15a7   :  { %1315 = vrot.lane.b32.xlu1 %v1309_v39, %s3237_s11 }
0x15a8   :  { %1311 = vrot.lane.b32.xlu0 %v1285_v41, %s3238_s3 }
0x1619   :  { %v1316_v42 = vpop.permute.xlu1 %1315 }
0x161a   :  { %v1312_v43 = vpop.permute.xlu0 %1311 }
0x161b   :  { %v1318_v20 = vsel %vm386_vm2, %v1312_v43, %v1316_v42 }
0x161c   :  { %2610 = vmatmul.mubr.msk.f32.vlgmr.msra.gmra.mrb[22].mxu0 %vm282_vm3, %v1318_v20 }
0x161d   :  { %2860 = vmatpush1.bf16.msra.mxu0 %v3297_v8  ;;  %1652 = vmatprep.mubr.f32.mxu0 %v3236_v3 }
0x161e   :  { %2862 = vmatprep.subr.bf16.mxu0 %v3299_v9 }
0x1621   :  { %2864 = vmatpush1.bf16.msra.mxu0 %v3315_v14 }
0x1622   :  { %2866 = vmatprep.subr.bf16.mxu0 %v3321_v16 }
0x1625   :  { %2868 = vmatpush1.bf16.msra.mxu0 %v3343_v23 }
0x1626   :  { %2870 = vmatprep.subr.bf16.mxu0 %v3347_v24 }
0x1629   :  { %2872 = vmatpush1.bf16.msra.mxu0 %v3359_v27 }
0x162a   :  { %2890 = vmatprep.subr.bf16.mxu0 %v3286_v4 }
0x16ef   :  { %v1388_v22 = vpop.f32.mrb[22].mxu0 }
0x16f0   :  { %v1389_v49 = vadd.f32 %v1388_v22, %v3383_v34  ;;  %v1390_v44 = vpop.f32.mrb[23].mxu0 }
0x16f1   :  { %v1391_v45 = vadd.f32 %v1390_v44, %v3401_v55 }
0x16f2   :  { %v1394_v46 = vadd.f32 %v1389_v49, %v3488_v54 }
0x16f3   :  { %3100 = vtanh.f32 %v1391_v45  ;;  %v2612_v63 = vmul.f32 -1.442695, %v1391_v45 }
0x16f4   :  { %3102 = vtanh.f32 %v1394_v46  ;;  %v2611_v0 = vmul.f32 -1.442695, %v1394_v46 }
0x16f5   :  { %3104 = vpow2.f32 %v2612_v63 }
0x16f6   :  { %3106 = vpow2.f32 %v2611_v0 }
0x16fd   :  { %v3101_v48 = vpop.eup %3100 }
0x16fe   :  { %v3103_v62 = vpop.eup %3102  ;;  %1428 = vrot.lane.b32.xlu1 %v3101_v48, %s3237_s11 }
0x16ff   :  { %1404 = vrot.lane.b32.xlu0 %v3103_v62, %s3237_s11  ;;  %v3105_v1 = vpop.eup %3104 }
0x1700   :  { %v3107_v50 = vpop.eup %3106  ;;  %v1422_v2 = vadd.f32 1.0, %v3105_v1 }
0x1701   :  { %v1398_v5 = vadd.f32 1.0, %v3107_v50 }
0x1702   :  { %3108 = vrcp.f32 %v1422_v2 }
0x1703   :  { %3110 = vrcp.f32 %v1398_v5 }
0x170c   :  { %v3109_v6 = vpop.eup %3108 }
0x170d   :  { %v3111_v7 = vpop.eup %3110  ;;  %v1426_v47 = vmul.f32 %v3109_v6, %v1303_v33 }
0x170e   :  { %v1402_v15 = vmul.f32 %v3111_v7, %v1279_v38 }
0x1770   :  { %v1429_v54 = vpop.permute.xlu1 %1428 }
0x1771   :  { %v1431_v10 = vmul.f32 %v3109_v6, %v1429_v54  ;;  %v1405_v11 = vpop.permute.xlu0 %1404 }
0x1772   :  { %v1407_v12 = vmul.f32 %v3111_v7, %v1405_v11 }
0x1773   :  { %1433 = vrot.lane.b32.xlu1 %v1431_v10, %s3238_s3 }
0x1774   :  { %1409 = vrot.lane.b32.xlu0 %v1407_v12, %s3238_s3 }
0x17e5   :  { %v1434_v13 = vpop.permute.xlu1 %1433 }
0x17e6   :  { %v1436_v17 = vadd.f32 %v1434_v13, %v1426_v47  ;;  %v1410_v18 = vpop.permute.xlu0 %1409 }
0x17e7   :  { %v1412_v19 = vadd.f32 %v1410_v18, %v1402_v15 }
0x17e8   :  { %3112 = vtanh.f32 %v1436_v17 }
0x17e9   :  { %3114 = vtanh.f32 %v1412_v19 }
0x17f2   :  { %v3113_v21 = vpop.eup %3112 }
0x17f3   :  { %v3115_v51 = vpop.eup %3114  ;;  %1439 = vrot.lane.b32.xlu1 %v3113_v21, %s3237_s11 }
0x17f4   :  { %1415 = vrot.lane.b32.xlu0 %v3115_v51, %s3237_s11 }
0x1865   :  { %v1440_v25 = vpop.permute.xlu1 %1439 }
0x1866   :  { %v1442_v28 = vmul.f32 %v3109_v6, %v1440_v25  ;;  %v1416_v26 = vpop.permute.xlu0 %1415 }
0x1867   :  { %v1418_v29 = vmul.f32 %v3111_v7, %v1416_v26 }
0x1868   :  { %1448 = vrot.lane.b32.xlu1 %v1442_v28, %s3237_s11 }
0x1869   :  { %1444 = vrot.lane.b32.xlu0 %v1418_v29, %s3238_s3 }
0x18da   :  { %v1449_v30 = vpop.permute.xlu1 %1448 }
0x18db   :  { %v1445_v31 = vpop.permute.xlu0 %1444 }
0x18dc   :  { %v1451_v32 = vsel %vm386_vm2, %v1445_v31, %v1449_v30 }
0x18dd   :  { %2613 = vmatmul.mubr.msk.f32.vlgmr.msra.gmra.mrb[10].mxu1 %vm282_vm3, %v1451_v32 }
0x18de   :  { %2876 = vmatpush1.bf16.msra.mxu1 %v3297_v8  ;;  %1785 = vmatprep.mubr.f32.mxu1 %v3236_v3 }
0x18df   :  { %2878 = vmatprep.subr.bf16.mxu1 %v3299_v9 }
0x18e2   :  { %2880 = vmatpush1.bf16.msra.mxu1 %v3315_v14 }
0x18e3   :  { %2882 = vmatprep.subr.bf16.mxu1 %v3321_v16 }
0x18e6   :  { %2884 = vmatpush1.bf16.msra.mxu1 %v3343_v23 }
0x18e7   :  { %2886 = vmatprep.subr.bf16.mxu1 %v3347_v24 }
0x18ea   :  { %2888 = vmatpush1.bf16.msra.mxu1 %v3359_v27 }
0x18eb   :  { %2906 = vmatprep.subr.bf16.mxu1 %v3286_v4 }
0x19b0   :  { %v1521_v33 = vpop.f32.mrb[10].mxu1 }
0x19b1   :  { %v1522_v36 = vadd.f32 %v1521_v33, %v3383_v34  ;;  %v1523_v38 = vpop.f32.mrb[11].mxu1 }
0x19b2   :  { %v1524_v52 = vadd.f32 %v1523_v38, %v3401_v55 }
0x19b3   :  { %v1527_v35 = vadd.f32 %v3486_v53, %v1522_v36 }
0x19b4   :  { %3116 = vtanh.f32 %v1524_v52  ;;  %v2615_v40 = vmul.f32 -1.442695, %v1524_v52 }
0x19b5   :  { %3118 = vtanh.f32 %v1527_v35  ;;  %v2614_v41 = vmul.f32 -1.442695, %v1527_v35 }
0x19b6   :  { %3120 = vpow2.f32 %v2615_v40 }
0x19b7   :  { %3122 = vpow2.f32 %v2614_v41 }
0x19be   :  { %v3117_v37 = vpop.eup %3116 }
0x19bf   :  { %v3119_v39 = vpop.eup %3118  ;;  %1561 = vrot.lane.b32.xlu1 %v3117_v37, %s3237_s11 }
0x19c0   :  { %1537 = vrot.lane.b32.xlu0 %v3119_v39, %s3237_s11  ;;  %v3121_v42 = vpop.eup %3120 }
0x19c1   :  { %v3123_v43 = vpop.eup %3122  ;;  %v1555_v20 = vadd.f32 1.0, %v3121_v42 }
0x19c2   :  { %v1531_v22 = vadd.f32 1.0, %v3123_v43 }
0x19c3   :  { %3124 = vrcp.f32 %v1555_v20 }
0x19c4   :  { %3126 = vrcp.f32 %v1531_v22 }
0x19cd   :  { %v3125_v49 = vpop.eup %3124 }
0x19ce   :  { %v3127_v44 = vpop.eup %3126  ;;  %v1559_v62 = vmul.f32 %v3125_v49, %v1436_v17 }
0x19cf   :  { %v1535_v0 = vmul.f32 %v3127_v44, %v1412_v19 }
0x1a31   :  { %v1562_v53 = vpop.permute.xlu1 %1561 }
0x1a32   :  { %v1564_v45 = vmul.f32 %v3125_v49, %v1562_v53  ;;  %v1538_v46 = vpop.permute.xlu0 %1537 }
0x1a33   :  { %v1540_v48 = vmul.f32 %v3127_v44, %v1538_v46 }
0x1a34   :  { %1566 = vrot.lane.b32.xlu1 %v1564_v45, %s3238_s3 }
0x1a35   :  { %1542 = vrot.lane.b32.xlu0 %v1540_v48, %s3238_s3 }
0x1aa6   :  { %v1567_v63 = vpop.permute.xlu1 %1566 }
0x1aa7   :  { %v1569_v1 = vadd.f32 %v1567_v63, %v1559_v62  ;;  %v1543_v50 = vpop.permute.xlu0 %1542 }
0x1aa8   :  { %v1545_v2 = vadd.f32 %v1543_v50, %v1535_v0 }
0x1aa9   :  { %3128 = vtanh.f32 %v1569_v1 }
0x1aaa   :  { %3130 = vtanh.f32 %v1545_v2 }
0x1ab3   :  { %v3129_v5 = vpop.eup %3128 }
0x1ab4   :  { %v3131_v6 = vpop.eup %3130  ;;  %1572 = vrot.lane.b32.xlu1 %v3129_v5, %s3237_s11 }
0x1ab5   :  { %1548 = vrot.lane.b32.xlu0 %v3131_v6, %s3237_s11 }
0x1b26   :  { %v1573_v54 = vpop.permute.xlu1 %1572 }
0x1b27   :  { %v1575_v7 = vmul.f32 %v3125_v49, %v1573_v54  ;;  %v1549_v10 = vpop.permute.xlu0 %1548 }
0x1b28   :  { %v1551_v11 = vmul.f32 %v3127_v44, %v1549_v10 }
0x1b29   :  { %1581 = vrot.lane.b32.xlu1 %v1575_v7, %s3237_s11 }
0x1b2a   :  { %1577 = vrot.lane.b32.xlu0 %v1551_v11, %s3238_s3 }
0x1b9b   :  { %v1582_v12 = vpop.permute.xlu1 %1581 }
0x1b9c   :  { %v1578_v47 = vpop.permute.xlu0 %1577 }
0x1b9d   :  { %v1584_v13 = vsel %vm386_vm2, %v1578_v47, %v1582_v12 }
0x1b9e   :  { %2616 = vmatmul.mubr.msk.f32.vlgmr.msra.gmra.mrb[24].mxu0 %vm282_vm3, %v1584_v13 }
0x1b9f   :  { %2892 = vmatpush1.bf16.msra.mxu0 %v3297_v8  ;;  %1918 = vmatprep.mubr.f32.mxu0 %v3236_v3 }
0x1ba0   :  { %2894 = vmatprep.subr.bf16.mxu0 %v3299_v9 }
0x1ba3   :  { %2896 = vmatpush1.bf16.msra.mxu0 %v3315_v14 }
0x1ba4   :  { %2898 = vmatprep.subr.bf16.mxu0 %v3321_v16 }
0x1ba7   :  { %2900 = vmatpush1.bf16.msra.mxu0 %v3343_v23 }
0x1ba8   :  { %2902 = vmatprep.subr.bf16.mxu0 %v3347_v24 }
0x1bab   :  { %2904 = vmatpush1.bf16.msra.mxu0 %v3359_v27 }
0x1bac   :  { %2922 = vmatprep.subr.bf16.mxu0 %v3286_v4 }
0x1c71   :  { %v1654_v15 = vpop.f32.mrb[24].mxu0 }
0x1c72   :  { %v1655_v17 = vadd.f32 %v1654_v15, %v3383_v34  ;;  %v1656_v18 = vpop.f32.mrb[25].mxu0 }
0x1c73   :  { %v1657_v19 = vadd.f32 %v1656_v18, %v3401_v55 }
0x1c74   :  { %v1660_v21 = vadd.f32 %v1655_v17, %v3492_v57 }
0x1c75   :  { %3132 = vtanh.f32 %v1657_v19  ;;  %v2618_v28 = vmul.f32 -1.442695, %v1657_v19 }
0x1c76   :  { %3134 = vtanh.f32 %v1660_v21  ;;  %v2617_v26 = vmul.f32 -1.442695, %v1660_v21 }
0x1c77   :  { %3136 = vpow2.f32 %v2618_v28 }
0x1c78   :  { %3138 = vpow2.f32 %v2617_v26 }
0x1c7f   :  { %v3133_v51 = vpop.eup %3132 }
0x1c80   :  { %v3135_v25 = vpop.eup %3134  ;;  %1694 = vrot.lane.b32.xlu1 %v3133_v51, %s3237_s11 }
0x1c81   :  { %1670 = vrot.lane.b32.xlu0 %v3135_v25, %s3237_s11  ;;  %v3137_v29 = vpop.eup %3136 }
0x1c82   :  { %v3139_v30 = vpop.eup %3138  ;;  %v1688_v31 = vadd.f32 1.0, %v3137_v29 }
0x1c83   :  { %v1664_v32 = vadd.f32 1.0, %v3139_v30 }
0x1c84   :  { %3140 = vrcp.f32 %v1688_v31 }
0x1c85   :  { %3142 = vrcp.f32 %v1664_v32 }
0x1c8e   :  { %v3141_v33 = vpop.eup %3140 }
0x1c8f   :  { %v3143_v36 = vpop.eup %3142  ;;  %v1692_v37 = vmul.f32 %v3141_v33, %v1569_v1 }
0x1c90   :  { %v1668_v40 = vmul.f32 %v3143_v36, %v1545_v2 }
0x1cf2   :  { %v1695_v57 = vpop.permute.xlu1 %1694 }
0x1cf3   :  { %v1697_v38 = vmul.f32 %v3141_v33, %v1695_v57  ;;  %v1671_v52 = vpop.permute.xlu0 %1670 }
0x1cf4   :  { %v1673_v35 = vmul.f32 %v3143_v36, %v1671_v52 }
0x1cf5   :  { %1699 = vrot.lane.b32.xlu1 %v1697_v38, %s3238_s3 }
0x1cf6   :  { %1675 = vrot.lane.b32.xlu0 %v1673_v35, %s3238_s3 }
0x1d67   :  { %v1700_v39 = vpop.permute.xlu1 %1699 }
0x1d68   :  { %v1702_v41 = vadd.f32 %v1700_v39, %v1692_v37  ;;  %v1676_v42 = vpop.permute.xlu0 %1675 }
0x1d69   :  { %v1678_v43 = vadd.f32 %v1676_v42, %v1668_v40 }
0x1d6a   :  { %3144 = vtanh.f32 %v1702_v41 }
0x1d6b   :  { %3146 = vtanh.f32 %v1678_v43 }
0x1d74   :  { %v3145_v20 = vpop.eup %3144 }
0x1d75   :  { %v3147_v22 = vpop.eup %3146  ;;  %1705 = vrot.lane.b32.xlu1 %v3145_v20, %s3237_s11 }
0x1d76   :  { %1681 = vrot.lane.b32.xlu0 %v3147_v22, %s3237_s11 }
0x1de7   :  { %v1706_v49 = vpop.permute.xlu1 %1705 }
0x1de8   :  { %v1708_v53 = vmul.f32 %v3141_v33, %v1706_v49  ;;  %v1682_v44 = vpop.permute.xlu0 %1681 }
0x1de9   :  { %v1684_v45 = vmul.f32 %v3143_v36, %v1682_v44 }
0x1dea   :  { %1714 = vrot.lane.b32.xlu1 %v1708_v53, %s3237_s11 }
0x1deb   :  { %1710 = vrot.lane.b32.xlu0 %v1684_v45, %s3238_s3 }
0x1e5c   :  { %v1715_v46 = vpop.permute.xlu1 %1714 }
0x1e5d   :  { %v1711_v48 = vpop.permute.xlu0 %1710 }
0x1e5e   :  { %v1717_v62 = vsel %vm386_vm2, %v1711_v48, %v1715_v46 }
0x1e5f   :  { %2619 = vmatmul.mubr.msk.f32.vlgmr.msra.gmra.mrb[12].mxu1 %vm282_vm3, %v1717_v62 }
0x1e60   :  { %2908 = vmatpush1.bf16.msra.mxu1 %v3297_v8  ;;  %2051 = vmatprep.mubr.f32.mxu1 %v3236_v3 }
0x1e61   :  { %2910 = vmatprep.subr.bf16.mxu1 %v3299_v9 }
0x1e64   :  { %2912 = vmatpush1.bf16.msra.mxu1 %v3315_v14 }
0x1e65   :  { %2914 = vmatprep.subr.bf16.mxu1 %v3321_v16 }
0x1e68   :  { %2916 = vmatpush1.bf16.msra.mxu1 %v3343_v23 }
0x1e69   :  { %2918 = vmatprep.subr.bf16.mxu1 %v3347_v24 }
0x1e6c   :  { %2920 = vmatpush1.bf16.msra.mxu1 %v3359_v27 }
0x1e6d   :  { %2938 = vmatprep.subr.bf16.mxu1 %v3286_v4 }
0x1f32   :  { %v1787_v63 = vpop.f32.mrb[12].mxu1 }
0x1f33   :  { %v1788_v0 = vadd.f32 %v1787_v63, %v3383_v34  ;;  %v1789_v1 = vpop.f32.mrb[13].mxu1 }
0x1f34   :  { %v1790_v50 = vadd.f32 %v1789_v1, %v3401_v55 }
0x1f35   :  { %v1793_v2 = vadd.f32 %v3490_v56, %v1788_v0 }
0x1f36   :  { %3148 = vtanh.f32 %v1790_v50  ;;  %v2621_v54 = vmul.f32 -1.442695, %v1790_v50 }
0x1f37   :  { %3150 = vtanh.f32 %v1793_v2  ;;  %v2620_v7 = vmul.f32 -1.442695, %v1793_v2 }
0x1f38   :  { %3152 = vpow2.f32 %v2621_v54 }
0x1f39   :  { %3154 = vpow2.f32 %v2620_v7 }
0x1f40   :  { %v3149_v5 = vpop.eup %3148 }
0x1f41   :  { %v3151_v6 = vpop.eup %3150  ;;  %1827 = vrot.lane.b32.xlu1 %v3149_v5, %s3237_s11 }
0x1f42   :  { %1803 = vrot.lane.b32.xlu0 %v3151_v6, %s3237_s11  ;;  %v3153_v10 = vpop.eup %3152 }
0x1f43   :  { %v3155_v11 = vpop.eup %3154  ;;  %v1821_v12 = vadd.f32 1.0, %v3153_v10 }
0x1f44   :  { %v1797_v47 = vadd.f32 1.0, %v3155_v11 }
0x1f45   :  { %3156 = vrcp.f32 %v1821_v12 }
0x1f46   :  { %3158 = vrcp.f32 %v1797_v47 }
0x1f4f   :  { %v3157_v13 = vpop.eup %3156 }
0x1f50   :  { %v3159_v15 = vpop.eup %3158  ;;  %v1825_v21 = vmul.f32 %v3157_v13, %v1702_v41 }
0x1f51   :  { %v1801_v25 = vmul.f32 %v3159_v15, %v1678_v43 }
0x1fb3   :  { %v1828_v56 = vpop.permute.xlu1 %1827 }
0x1fb4   :  { %v1830_v17 = vmul.f32 %v3157_v13, %v1828_v56  ;;  %v1804_v18 = vpop.permute.xlu0 %1803 }
0x1fb5   :  { %v1806_v19 = vmul.f32 %v3159_v15, %v1804_v18 }
0x1fb6   :  { %1832 = vrot.lane.b32.xlu1 %v1830_v17, %s3238_s3 }
0x1fb7   :  { %1808 = vrot.lane.b32.xlu0 %v1806_v19, %s3238_s3 }
0x2028   :  { %v1833_v51 = vpop.permute.xlu1 %1832 }
0x2029   :  { %v1835_v28 = vadd.f32 %v1833_v51, %v1825_v21  ;;  %v1809_v26 = vpop.permute.xlu0 %1808 }
0x202a   :  { %v1811_v29 = vadd.f32 %v1809_v26, %v1801_v25 }
0x202b   :  { %3160 = vtanh.f32 %v1835_v28 }
0x202c   :  { %3162 = vtanh.f32 %v1811_v29 }
0x2035   :  { %v3161_v30 = vpop.eup %3160 }
0x2036   :  { %v3163_v31 = vpop.eup %3162  ;;  %1838 = vrot.lane.b32.xlu1 %v3161_v30, %s3237_s11 }
0x2037   :  { %1814 = vrot.lane.b32.xlu0 %v3163_v31, %s3237_s11 }
0x20a8   :  { %v1839_v32 = vpop.permute.xlu1 %1838 }
0x20a9   :  { %v1841_v33 = vmul.f32 %v3157_v13, %v1839_v32  ;;  %v1815_v57 = vpop.permute.xlu0 %1814 }
0x20aa   :  { %v1817_v36 = vmul.f32 %v3159_v15, %v1815_v57 }
0x20ab   :  { %1847 = vrot.lane.b32.xlu1 %v1841_v33, %s3237_s11 }
0x20ac   :  { %1843 = vrot.lane.b32.xlu0 %v1817_v36, %s3238_s3 }
0x211d   :  { %v1848_v38 = vpop.permute.xlu1 %1847 }
0x211e   :  { %v1844_v52 = vpop.permute.xlu0 %1843 }
0x211f   :  { %v1850_v35 = vsel %vm386_vm2, %v1844_v52, %v1848_v38 }
0x2120   :  { %2622 = vmatmul.mubr.msk.f32.vlgmr.msra.gmra.mrb[26].mxu0 %vm282_vm3, %v1850_v35 }
0x2121   :  { %2924 = vmatpush1.bf16.msra.mxu0 %v3297_v8  ;;  %2184 = vmatprep.mubr.f32.mxu0 %v3236_v3 }
0x2122   :  { %2926 = vmatprep.subr.bf16.mxu0 %v3299_v9 }
0x2125   :  { %2928 = vmatpush1.bf16.msra.mxu0 %v3315_v14 }
0x2126   :  { %2930 = vmatprep.subr.bf16.mxu0 %v3321_v16 }
0x2129   :  { %2932 = vmatpush1.bf16.msra.mxu0 %v3343_v23 }
0x212a   :  { %2934 = vmatprep.subr.bf16.mxu0 %v3347_v24 }
0x212d   :  { %2936 = vmatpush1.bf16.msra.mxu0 %v3359_v27 }
0x212e   :  { %2954 = vmatprep.subr.bf16.mxu0 %v3286_v4 }
0x21f3   :  { %v1920_v37 = vpop.f32.mrb[26].mxu0 }
0x21f4   :  { %v1921_v39 = vadd.f32 %v1920_v37, %v3383_v34  ;;  %v1922_v40 = vpop.f32.mrb[27].mxu0 }
0x21f5   :  { %v1923_v41 = vadd.f32 %v1922_v40, %v3401_v55 }
0x21f6   :  { %v1926_v42 = vadd.f32 %v1921_v39, %v3496_v59 }
0x21f7   :  { %3164 = vtanh.f32 %v1923_v41  ;;  %v2624_v22 = vmul.f32 -1.442695, %v1923_v41 }
0x21f8   :  { %3166 = vtanh.f32 %v1926_v42  ;;  %v2623_v49 = vmul.f32 -1.442695, %v1926_v42 }
0x21f9   :  { %3168 = vpow2.f32 %v2624_v22 }
0x21fa   :  { %3170 = vpow2.f32 %v2623_v49 }
0x2201   :  { %v3165_v43 = vpop.eup %3164 }
0x2202   :  { %v3167_v20 = vpop.eup %3166  ;;  %1960 = vrot.lane.b32.xlu1 %v3165_v43, %s3237_s11 }
0x2203   :  { %1936 = vrot.lane.b32.xlu0 %v3167_v20, %s3237_s11  ;;  %v3169_v4 = vpop.eup %3168 }
0x2204   :  { %v3171_v53 = vpop.eup %3170  ;;  %v1954_v44 = vadd.f32 1.0, %v3169_v4 }
0x2205   :  { %v1930_v45 = vadd.f32 1.0, %v3171_v53 }
0x2206   :  { %3172 = vrcp.f32 %v1954_v44 }
0x2207   :  { %3174 = vrcp.f32 %v1930_v45 }
0x2210   :  { %v3173_v46 = vpop.eup %3172 }
0x2211   :  { %v3175_v48 = vpop.eup %3174  ;;  %v1958_v1 = vmul.f32 %v3173_v46, %v1835_v28 }
0x2212   :  { %v1934_v2 = vmul.f32 %v3175_v48, %v1811_v29 }
0x2274   :  { %v1961_v59 = vpop.permute.xlu1 %1960 }
0x2275   :  { %v1963_v62 = vmul.f32 %v3173_v46, %v1961_v59  ;;  %v1937_v63 = vpop.permute.xlu0 %1936 }
0x2276   :  { %v1939_v0 = vmul.f32 %v3175_v48, %v1937_v63 }
0x2277   :  { %1965 = vrot.lane.b32.xlu1 %v1963_v62, %s3238_s3 }
0x2278   :  { %1941 = vrot.lane.b32.xlu0 %v1939_v0, %s3238_s3 }
0x22e9   :  { %v1966_v50 = vpop.permute.xlu1 %1965 }
0x22ea   :  { %v1968_v5 = vadd.f32 %v1966_v50, %v1958_v1  ;;  %v1942_v6 = vpop.permute.xlu0 %1941 }
0x22eb   :  { %v1944_v54 = vadd.f32 %v1942_v6, %v1934_v2 }
0x22ec   :  { %3176 = vtanh.f32 %v1968_v5 }
0x22ed   :  { %3178 = vtanh.f32 %v1944_v54 }
0x22f6   :  { %v3177_v7 = vpop.eup %3176 }
0x22f7   :  { %v3179_v10 = vpop.eup %3178  ;;  %1971 = vrot.lane.b32.xlu1 %v3177_v7, %s3237_s11 }
0x22f8   :  { %1947 = vrot.lane.b32.xlu0 %v3179_v10, %s3237_s11 }
0x2369   :  { %v1972_v11 = vpop.permute.xlu1 %1971 }
0x236a   :  { %v1974_v12 = vmul.f32 %v3173_v46, %v1972_v11  ;;  %v1948_v47 = vpop.permute.xlu0 %1947 }
0x236b   :  { %v1950_v13 = vmul.f32 %v3175_v48, %v1948_v47 }
0x236c   :  { %1980 = vrot.lane.b32.xlu1 %v1974_v12, %s3237_s11 }
0x236d   :  { %1976 = vrot.lane.b32.xlu0 %v1950_v13, %s3238_s3 }
0x23de   :  { %v1981_v56 = vpop.permute.xlu1 %1980 }
0x23df   :  { %v1977_v15 = vpop.permute.xlu0 %1976 }
0x23e0   :  { %v1983_v17 = vsel %vm386_vm2, %v1977_v15, %v1981_v56 }
0x23e1   :  { %2625 = vmatmul.mubr.msk.f32.vlgmr.msra.gmra.mrb[14].mxu1 %vm282_vm3, %v1983_v17 }
0x23e2   :  { %2940 = vmatpush1.bf16.msra.mxu1 %v3297_v8  ;;  %2317 = vmatprep.mubr.f32.mxu1 %v3236_v3 }
0x23e3   :  { %2942 = vmatprep.subr.bf16.mxu1 %v3299_v9 }
0x23e6   :  { %2944 = vmatpush1.bf16.msra.mxu1 %v3315_v14 }
0x23e7   :  { %2946 = vmatprep.subr.bf16.mxu1 %v3321_v16 }
0x23ea   :  { %2948 = vmatpush1.bf16.msra.mxu1 %v3343_v23 }
0x23eb   :  { %2950 = vmatprep.subr.bf16.mxu1 %v3347_v24 }
0x23ee   :  { %2952 = vmatpush1.bf16.msra.mxu1 %v3359_v27 }
0x24b4   :  { %v2053_v18 = vpop.f32.mrb[14].mxu1 }
0x24b5   :  { %v2054_v19 = vadd.f32 %v2053_v18, %v3383_v34  ;;  %v2055_v21 = vpop.f32.mrb[15].mxu1 }
0x24b6   :  { %v2056_v51 = vadd.f32 %v2055_v21, %v3401_v55 }
0x24b7   :  { %v2059_v25 = vadd.f32 %v3494_v58, %v2054_v19 }
0x24b8   :  { %3180 = vtanh.f32 %v2056_v51  ;;  %v2627_v29 = vmul.f32 -1.442695, %v2056_v51 }
0x24b9   :  { %3182 = vtanh.f32 %v2059_v25  ;;  %v2626_v30 = vmul.f32 -1.442695, %v2059_v25 }
0x24ba   :  { %3184 = vpow2.f32 %v2627_v29 }
0x24bb   :  { %3186 = vpow2.f32 %v2626_v30 }
0x24c2   :  { %v3181_v28 = vpop.eup %3180 }
0x24c3   :  { %v3183_v26 = vpop.eup %3182  ;;  %2093 = vrot.lane.b32.xlu1 %v3181_v28, %s3237_s11 }
0x24c4   :  { %2069 = vrot.lane.b32.xlu0 %v3183_v26, %s3237_s11  ;;  %v3185_v31 = vpop.eup %3184 }
0x24c5   :  { %v3187_v32 = vpop.eup %3186  ;;  %v2087_v33 = vadd.f32 1.0, %v3185_v31 }
0x24c6   :  { %v2063_v57 = vadd.f32 1.0, %v3187_v32 }
0x24c7   :  { %3188 = vrcp.f32 %v2087_v33 }
0x24c8   :  { %3190 = vrcp.f32 %v2063_v57 }
0x24d1   :  { %v3189_v36 = vpop.eup %3188 }
0x24d2   :  { %v3191_v38 = vpop.eup %3190  ;;  %v2091_v39 = vmul.f32 %v3189_v36, %v1968_v5 }
0x24d3   :  { %v2067_v41 = vmul.f32 %v3191_v38, %v1944_v54 }
0x2535   :  { %v2094_v58 = vpop.permute.xlu1 %2093 }
0x2536   :  { %v2096_v52 = vmul.f32 %v3189_v36, %v2094_v58  ;;  %v2070_v35 = vpop.permute.xlu0 %2069 }
0x2537   :  { %v2072_v37 = vmul.f32 %v3191_v38, %v2070_v35 }
0x2538   :  { %2098 = vrot.lane.b32.xlu1 %v2096_v52, %s3238_s3 }
0x2539   :  { %2074 = vrot.lane.b32.xlu0 %v2072_v37, %s3238_s3 }
0x25aa   :  { %v2099_v40 = vpop.permute.xlu1 %2098 }
0x25ab   :  { %v2101_v42 = vadd.f32 %v2099_v40, %v2091_v39  ;;  %v2075_v43 = vpop.permute.xlu0 %2074 }
0x25ac   :  { %v2077_v20 = vadd.f32 %v2075_v43, %v2067_v41 }
0x25ad   :  { %3192 = vtanh.f32 %v2101_v42 }
0x25ae   :  { %3194 = vtanh.f32 %v2077_v20 }
0x25b7   :  { %v3193_v22 = vpop.eup %3192 }
0x25b8   :  { %v3195_v49 = vpop.eup %3194  ;;  %2104 = vrot.lane.b32.xlu1 %v3193_v22, %s3237_s11 }
0x25b9   :  { %2080 = vrot.lane.b32.xlu0 %v3195_v49, %s3237_s11 }
0x262a   :  { %v2105_v4 = vpop.permute.xlu1 %2104 }
0x262b   :  { %v2107_v53 = vmul.f32 %v3189_v36, %v2105_v4  ;;  %v2081_v44 = vpop.permute.xlu0 %2080 }
0x262c   :  { %v2083_v45 = vmul.f32 %v3191_v38, %v2081_v44 }
0x262d   :  { %2113 = vrot.lane.b32.xlu1 %v2107_v53, %s3237_s11 }
0x262e   :  { %2109 = vrot.lane.b32.xlu0 %v2083_v45, %s3238_s3 }
0x269f   :  { %v2114_v46 = vpop.permute.xlu1 %2113 }
0x26a0   :  { %v2110_v59 = vpop.permute.xlu0 %2109 }
0x26a1   :  { %v2116_v48 = vsel %vm386_vm2, %v2110_v59, %v2114_v46 }
0x26a2   :  { %2628 = vmatmul.mubr.msk.f32.vlgmr.msra.gmra.mrb[28].mxu0 %vm282_vm3, %v2116_v48 }
0x26a3   :  { %2956 = vmatpush1.bf16.msra.mxu0 %v3297_v8  ;;  %2450 = vmatprep.mubr.f32.mxu0 %v3236_v3 }
0x26a4   :  { %2958 = vmatprep.subr.bf16.mxu0 %v3299_v9 }
0x26a7   :  { %2960 = vmatpush1.bf16.msra.mxu0 %v3315_v14 }
0x26a8   :  { %2962 = vmatprep.subr.bf16.mxu0 %v3321_v16 }
0x26ab   :  { %2964 = vmatpush1.bf16.msra.mxu0 %v3343_v23 }
0x26ac   :  { %2966 = vmatprep.subr.bf16.mxu0 %v3347_v24 }
0x26af   :  { %2968 = vmatpush1.bf16.msra.mxu0 %v3359_v27 }
0x2775   :  { %v2186_v62 = vpop.f32.mrb[28].mxu0 }
0x2776   :  { %v2187_v63 = vadd.f32 %v2186_v62, %v3383_v34  ;;  %v2188_v0 = vpop.f32.mrb[29].mxu0 }
0x2777   :  { %v2189_v8 = vadd.f32 %v2188_v0, %v3401_v55 }
0x2778   :  { %v2192_v1 = vadd.f32 %v2187_v63, %v3500_v61 }
0x2779   :  { %3196 = vtanh.f32 %v2189_v8  ;;  %v2630_v16 = vmul.f32 -1.442695, %v2189_v8 }
0x277a   :  { %3198 = vtanh.f32 %v2192_v1  ;;  %v2629_v23 = vmul.f32 -1.442695, %v2192_v1 }
0x277b   :  { %3200 = vpow2.f32 %v2630_v16 }
0x277c   :  { %3202 = vpow2.f32 %v2629_v23 }
0x2783   :  { %v3197_v9 = vpop.eup %3196 }
0x2784   :  { %v3199_v14 = vpop.eup %3198  ;;  %2226 = vrot.lane.b32.xlu1 %v3197_v9, %s3237_s11 }
0x2785   :  { %2202 = vrot.lane.b32.xlu0 %v3199_v14, %s3237_s11  ;;  %v3201_v24 = vpop.eup %3200 }
0x2786   :  { %v3203_v27 = vpop.eup %3202  ;;  %v2220_v50 = vadd.f32 1.0, %v3201_v24 }
0x2787   :  { %v2196_v2 = vadd.f32 1.0, %v3203_v27 }
0x2788   :  { %3204 = vrcp.f32 %v2220_v50 }
0x2789   :  { %3206 = vrcp.f32 %v2196_v2 }
0x2792   :  { %v3205_v5 = vpop.eup %3204 }
0x2793   :  { %v3207_v6 = vpop.eup %3206  ;;  %v2224_v11 = vmul.f32 %v3205_v5, %v2101_v42 }
0x2794   :  { %v2200_v47 = vmul.f32 %v3207_v6, %v2077_v20 }
0x27f6   :  { %v2227_v61 = vpop.permute.xlu1 %2226 }
0x27f7   :  { %v2229_v54 = vmul.f32 %v3205_v5, %v2227_v61  ;;  %v2203_v7 = vpop.permute.xlu0 %2202 }
0x27f8   :  { %v2205_v10 = vmul.f32 %v3207_v6, %v2203_v7 }
0x27f9   :  { %2231 = vrot.lane.b32.xlu1 %v2229_v54, %s3238_s3 }
0x27fa   :  { %2207 = vrot.lane.b32.xlu0 %v2205_v10, %s3238_s3 }
0x286b   :  { %v2232_v12 = vpop.permute.xlu1 %2231 }
0x286c   :  { %v2234_v13 = vadd.f32 %v2232_v12, %v2224_v11  ;;  %v2208_v56 = vpop.permute.xlu0 %2207  ;;  %v3239_v11 = vmov 0.0|0.0   ;;  %v2481_v12 = vld [vmem:[%s3831_s4 + $0x8] sm:$0xff] }
0x286d   :  { %v2210_v15 = vadd.f32 %v2208_v56, %v2200_v47  ;;  %2969 = vmatprep.subr.bf16.mxu1 %v3239_v11  ;;  %v2482_v47 = vld [vmem:[%s3831_s4 + $0x10] sm:$0xff]  ;;  %v2483_v56 = vld [vmem:[%s3831_s4 + $0x18] sm:$0xff] }
0x286e   :  { %3208 = vtanh.f32 %v2234_v13 }
0x286f   :  { %3210 = vtanh.f32 %v2210_v15 }
0x2878   :  { %v3209_v17 = vpop.eup %3208 }
0x2879   :  { %v3211_v18 = vpop.eup %3210  ;;  %2237 = vrot.lane.b32.xlu1 %v3209_v17, %s3237_s11 }
0x287a   :  { %2213 = vrot.lane.b32.xlu0 %v3211_v18, %s3237_s11 }
0x28eb   :  { %v2238_v19 = vpop.permute.xlu1 %2237 }
0x28ec   :  { %v2240_v21 = vmul.f32 %v3205_v5, %v2238_v19  ;;  %v2214_v51 = vpop.permute.xlu0 %2213 }
0x28ed   :  { %v2216_v25 = vmul.f32 %v3207_v6, %v2214_v51 }
0x28ee   :  { %2246 = vrot.lane.b32.xlu1 %v2240_v21, %s3237_s11 }
0x28ef   :  { %2242 = vrot.lane.b32.xlu0 %v2216_v25, %s3238_s3 }
0x2960   :  { %v2247_v28 = vpop.permute.xlu1 %2246 }
0x2961   :  { %v2243_v26 = vpop.permute.xlu0 %2242 }
0x2962   :  { %v2249_v29 = vsel %vm386_vm2, %v2243_v26, %v2247_v28 }
0x2963   :  { %2631 = vmatmul.mubr.msk.f32.vlgmr.msra.gmra.mrb[16].mxu1 %vm282_vm3, %v2249_v29 }
0x2964   :  { %2694 = vmatprep.mubr.msk.f32.mxu1 %vm3240_vm4, %v3236_v3  ;;  %v2636_v3 = vld [vmem:[%s3832_s5] ss:$0 sm:$0xff] }
0x2a36   :  { %v2319_v30 = vpop.f32.mrb[16].mxu1 }
0x2a37   :  { %v2320_v31 = vadd.f32 %v2319_v30, %v3383_v34  ;;  %v2321_v32 = vpop.f32.mrb[17].mxu1 }
0x2a38   :  { %v2322_v33 = vadd.f32 %v2321_v32, %v3401_v55 }
0x2a39   :  { %v2325_v57 = vadd.f32 %v3498_v60, %v2320_v31 }
0x2a3a   :  { %3212 = vtanh.f32 %v2322_v33  ;;  %v2633_v38 = vmul.f32 -1.442695, %v2322_v33 }
0x2a3b   :  { %3214 = vtanh.f32 %v2325_v57  ;;  %v2632_v52 = vmul.f32 -1.442695, %v2325_v57 }
0x2a3c   :  { %3216 = vpow2.f32 %v2633_v38 }
0x2a3d   :  { %3218 = vpow2.f32 %v2632_v52 }
0x2a44   :  { %v3213_v36 = vpop.eup %3212 }
0x2a45   :  { %v3215_v58 = vpop.eup %3214  ;;  %2359 = vrot.lane.b32.xlu1 %v3213_v36, %s3237_s11 }
0x2a46   :  { %2335 = vrot.lane.b32.xlu0 %v3215_v58, %s3237_s11  ;;  %v3217_v35 = vpop.eup %3216 }
0x2a47   :  { %v3219_v37 = vpop.eup %3218  ;;  %v2353_v34 = vadd.f32 1.0, %v3217_v35 }
0x2a48   :  { %v2329_v39 = vadd.f32 1.0, %v3219_v37 }
0x2a49   :  { %3220 = vrcp.f32 %v2353_v34 }
0x2a4a   :  { %3222 = vrcp.f32 %v2329_v39 }
0x2a53   :  { %v3221_v40 = vpop.eup %3220 }
0x2a54   :  { %v3223_v41 = vpop.eup %3222  ;;  %v2357_v22 = vmul.f32 %v3221_v40, %v2234_v13 }
0x2a55   :  { %v2333_v4 = vmul.f32 %v3223_v41, %v2210_v15  ;;  %v2973_v15 = vpack.c.bf16 %v2483_v56, %v2482_v47 }
0x2ab7   :  { %v2360_v60 = vpop.permute.xlu1 %2359 }
0x2ab8   :  { %v2362_v42 = vmul.f32 %v3221_v40, %v2360_v60  ;;  %v2336_v43 = vpop.permute.xlu0 %2335 }
0x2ab9   :  { %v2338_v20 = vmul.f32 %v3223_v41, %v2336_v43 }
0x2aba   :  { %2364 = vrot.lane.b32.xlu1 %v2362_v42, %s3238_s3 }
0x2abb   :  { %2340 = vrot.lane.b32.xlu0 %v2338_v20, %s3238_s3 }
0x2b2c   :  { %v2365_v49 = vpop.permute.xlu1 %2364 }
0x2b2d   :  { %v2367_v53 = vadd.f32 %v2365_v49, %v2357_v22  ;;  %v2341_v44 = vpop.permute.xlu0 %2340 }
0x2b2e   :  { %v2343_v45 = vadd.f32 %v2341_v44, %v2333_v4 }
0x2b2f   :  { %3224 = vtanh.f32 %v2367_v53 }
0x2b30   :  { %3226 = vtanh.f32 %v2343_v45 }
0x2b39   :  { %v3225_v46 = vpop.eup %3224 }
0x2b3a   :  { %v3227_v59 = vpop.eup %3226  ;;  %2370 = vrot.lane.b32.xlu1 %v3225_v46, %s3237_s11 }
0x2b3b   :  { %2346 = vrot.lane.b32.xlu0 %v3227_v59, %s3237_s11 }
0x2bac   :  { %v2371_v48 = vpop.permute.xlu1 %2370 }
0x2bad   :  { %v2373_v62 = vmul.f32 %v3221_v40, %v2371_v48  ;;  %v2347_v63 = vpop.permute.xlu0 %2346 }
0x2bae   :  { %v2349_v0 = vmul.f32 %v3223_v41, %v2347_v63 }
0x2baf   :  { %2379 = vrot.lane.b32.xlu1 %v2373_v62, %s3237_s11 }
0x2bb0   :  { %2375 = vrot.lane.b32.xlu0 %v2349_v0, %s3238_s3 }
0x2c21   :  { %v2380_v8 = vpop.permute.xlu1 %2379 }
0x2c22   :  { %v2376_v1 = vpop.permute.xlu0 %2375 }
0x2c23   :  { %v2382_v9 = vsel %vm386_vm2, %v2376_v1, %v2380_v8 }
0x2c24   :  { %2634 = vmatmul.mubr.msk.f32.vlgmr.msra.gmra.mrb[30].mxu0 %vm282_vm3, %v2382_v9 }
0x2cf7   :  { %v2452_v14 = vpop.f32.mrb[30].mxu0 }
0x2cf8   :  { %v2453_v16 = vpop.f32.mrb[31].mxu0 }
0x2cf9   :  { %v2454_v23 = vadd.f32 %v2453_v16, %v3401_v55  ;;  %v2480_v55 = vld [vmem:[%s3831_s4] sm:$0xff] }
0x2cfa   :  { %v2970_v13 = vpack.c.bf16 %v2481_v12, %v2480_v55 }
0x2cfb   :  { %3228 = vtanh.f32 %v2454_v23  ;;  %v2635_v27 = vmul.f32 -1.442695, %v2454_v23 }
0x2cfc   :  { %2971 = vmatpush3.bf16.msra.mxu1 %v2970_v13 }
0x2cfd   :  { %3230 = vpow2.f32 %v2635_v27  ;;  %2972 = vmatprep.subr.bf16.mxu1 %v3239_v11 }
0x2d00   :  { %2974 = vmatpush3.bf16.msra.mxu1 %v2973_v15 }
0x2d05   :  { %v3229_v24 = vpop.eup %3228 }
0x2d06   :  { %2465 = vrot.lane.b32.xlu0 %v3229_v24, %s3237_s11 }
0x2d07   :  { %v3231_v50 = vpop.eup %3230 }
0x2d08   :  { %v2459_v2 = vadd.f32 1.0, %v3231_v50 }
0x2d0a   :  { %3232 = vrcp.f32 %v2459_v2 }
0x2d14   :  { %v3233_v5 = vpop.eup %3232 }
0x2d15   :  { %v2463_v54 = vmul.f32 %v3233_v5, %v2367_v53 }
0x2d78   :  { %v2466_v61 = vpop.permute.xlu0 %2465 }
0x2d79   :  { %v2468_v6 = vmul.f32 %v3233_v5, %v2466_v61 }
0x2d7b   :  { %2470 = vrot.lane.b32.xlu1 %v2468_v6, %s3238_s3 }
0x2ded   :  { %v2471_v7 = vpop.permute.xlu1 %2470 }
0x2dee   :  { %v2473_v10 = vadd.f32 %v2471_v7, %v2463_v54 }
0x2df0   :  { %3234 = vtanh.f32 %v2473_v10 }
0x2dfa   :  { %v3235_v17 = vpop.eup %3234 }
0x2dfb   :  { %2476 = vrot.lane.b32.xlu0 %v3235_v17, %s3237_s11 }
0x2e6d   :  { %v2477_v18 = vpop.permute.xlu0 %2476 }
0x2e6e   :  { %v2479_v19 = vmul.f32 %v3233_v5, %v2477_v18 }
0x2e70   :  { %2492 = vrot.lane.b32.xlu1 %v2479_v19, %s3238_s3 }
0x2ee2   :  { %v2493_v21 = vpop.permute.xlu1 %2492 }
0x2ee3   :  { %2695 = vmatmul.mubr.msk.f32.vlgmr.msra.gmra.mrb[18].mxu1 %vm386_vm2, %v2493_v21 }
0x2fb6   :  { %v2562_v51 = vpop.f32.mrb[18].mxu1 }
0x2fb7   :  { %v2563_v25 = vadd.f32 %v2636_v3, %v2562_v51  ;;  %v2696_v28 = vpop.f32.mrb[19].mxu1 }
0x2fb9   :  { %2566 = vst [vmem:[%s3833_s6] sm:$0xff] %v2563_v25 }

</bundles_post_ra>
